<compile_context>
chip_gen: v7x
topology: tpu7x:2x2x1
jax: 0.10.0
libtpu: 0.0.40
codegen_flags: <defaults>
</compile_context>

<pallas_src>
import functools

import jax
import jax.numpy as jnp
from jax.experimental import pallas as pl
from jax.experimental.pallas import tpu as pltpu


# ---------------------------------------------------------------------------
# Kernels
# ---------------------------------------------------------------------------

def _agg1_kernel(adj_ref, x_ref, w1_ref, b1_ref, w2_ref, out_ref, acc_ref):
    """Layer-1 GCN: fused feature projection + aggregation + layer-2 pre-proj.

    p1      = X[k] @ W1                     (tiny, recomputed per step, f32)
    acc    += A_hat[i, k] @ p1              (bf16 MXU operands, f32 accumulate)
    at k == last:
        H1     = relu(acc + b1)             (f32 epilogue)
        out[i] = (H1 @ W2).astype(bf16)     (streaming panel for pass 2)
    """
    k = pl.program_id(1)

    @pl.when(k == 0)
    def _():
        acc_ref[...] = jnp.zeros_like(acc_ref)

    p1 = jnp.dot(x_ref[...], w1_ref[...], preferred_element_type=jnp.float32)
    acc_ref[...] += jnp.dot(
        adj_ref[...], p1.astype(jnp.bfloat16),
        preferred_element_type=jnp.float32)

    @pl.when(k == pl.num_programs(1) - 1)
    def _():
        h1 = jnp.maximum(acc_ref[...] + b1_ref[...], 0.0)
        out_ref[...] = jnp.dot(
            h1, w2_ref[...], preferred_element_type=jnp.float32
        ).astype(out_ref.dtype)


def _agg2_kernel(adj_ref, p2_ref, b2_ref, w3_ref, b3_ref, out_ref, acc_ref):
    """Layer-2 aggregation + fused Linear + log_softmax (lane-dense logits).

    acc += A_hat[i, k] @ (H1 W2)[k]
    at k == last:
        H2     = relu(acc + b2)
        logits = H2 @ W3_pad + b3_pad       (padded class lanes carry -1e30)
        out[i] = log_softmax(logits, axis=1) as a (TM, 128) slab
    """
    k = pl.program_id(1)

    @pl.when(k == 0)
    def _():
        acc_ref[...] = jnp.zeros_like(acc_ref)

    acc_ref[...] += jnp.dot(
        adj_ref[...], p2_ref[...], preferred_element_type=jnp.float32)

    @pl.when(k == pl.num_programs(1) - 1)
    def _():
        h2 = jnp.maximum(acc_ref[...] + b2_ref[...], 0.0)
        logits = jnp.dot(h2, w3_ref[...], preferred_element_type=jnp.float32)
        logits = logits + b3_ref[...]
        # exp/log -> EUP, row max/sum -> XLU: off the VALU critical path.
        m = jnp.max(logits, axis=1, keepdims=True)
        s = logits - m
        lse = jnp.log(jnp.sum(jnp.exp(s), axis=1, keepdims=True))
        out_ref[...] = s - lse


# ---------------------------------------------------------------------------
# Tiling plan
# ---------------------------------------------------------------------------

def _round_up(n, m):
    return -(-n // m) * m


def pad_to_tiles(n):
    """Padded node count: multiple of 128, and of 512 once it exceeds 512."""
    n_pad = _round_up(max(n, 128), 128)
    if n_pad > 512:
        n_pad = _round_up(n_pad, 512)
    return n_pad


def _pick_tiles(n_pad, tm_max=512, tk_max=2048):
    """Rectangular adjacency tile (tm rows, tk reduction cols).

    tk: as large as possible (bandwidth-bound kernel) up to 2048.
    tm: up to 512, but kept small enough that the 'parallel' i axis has
        >= 2 blocks when possible (v7x megacore sharding).
    """
    cands_k = [c for c in range(128, min(tk_max, n_pad) + 1, 128)
               if n_pad % c == 0]
    tk = max(cands_k)
    cands_m = [c for c in range(128, min(tm_max, n_pad) + 1, 128)
               if n_pad % c == 0]
    two_block = [c for c in cands_m if n_pad // c >= 2]
    tm = max(two_block) if two_block else max(cands_m)
    return tm, tk


# ---------------------------------------------------------------------------
# Wrapper
# ---------------------------------------------------------------------------

@jax.jit
def emotional_graph_nn(x, adj_hat_padded, params):
    """Forward pass.

    x:               (N, F) f32 node features.
    adj_hat_padded:  (N_pad, N_pad) bf16 normalized adjacency, zero-padded
                     (build once with pad_adjacency; NOT per call).
    params:          (w1, b1, w2, b2, w3, b3).
    """
    w1, b1, w2, b2, w3, b3 = params
    n, f = x.shape
    hidden = w1.shape[1]
    h2 = w2.shape[1]
    c = w3.shape[1]

    n_pad = adj_hat_padded.shape[0]
    tm, tk = _pick_tiles(n_pad)
    nbi = n_pad // tm
    nbk = n_pad // tk

    c_pad = _round_up(c, 128)            # lane-dense classifier output

    # Tiny per-call pads (O(N*F) and O(h2*128) bytes).
    x_p = jnp.zeros((n_pad, f), jnp.float32).at[:n, :].set(x)
    # Padded class lanes: zero weights, -1e30 bias -> exp() underflows to 0.
    w3_p = jnp.zeros((h2, c_pad), jnp.float32).at[:, :c].set(w3)
    b3_p = jnp.full((1, c_pad), -1e30, jnp.float32).at[:, :c].set(b3)

    # ---- pass 1: P2 = relu(A_hat @ (X @ W1) + b1) @ W2 ----------------------
    p2 = pl.pallas_call(
        _agg1_kernel,
        out_shape=jax.ShapeDtypeStruct((n_pad, h2), jnp.bfloat16),
        grid_spec=pltpu.PrefetchScalarGridSpec(
            num_scalar_prefetch=0,
            grid=(nbi, nbk),
            in_specs=[
                pl.BlockSpec((tm, tk), lambda i, k: (i, k)),      # A_hat tile
                pl.BlockSpec((tk, f), lambda i, k: (k, 0)),       # X block
                pl.BlockSpec((f, hidden), lambda i, k: (0, 0)),   # W1
                pl.BlockSpec((1, hidden), lambda i, k: (0, 0)),   # b1
                pl.BlockSpec((hidden, h2), lambda i, k: (0, 0)),  # W2
            ],
            out_specs=pl.BlockSpec((tm, h2), lambda i, k: (i, 0)),
            scratch_shapes=[pltpu.VMEM((tm, hidden), jnp.float32)],
        ),
        compiler_params=pltpu.CompilerParams(
            dimension_semantics=("parallel", "arbitrary")),
        cost_estimate=pl.CostEstimate(
            flops=2 * n_pad * n_pad * hidden
                  + 2 * nbi * n_pad * f * hidden
                  + 2 * n_pad * hidden * h2,
            transcendentals=0,
            bytes_accessed=n_pad * n_pad * 2            # adjacency stream
                           + nbi * n_pad * f * 4        # X re-read per i-block
                           + n_pad * h2 * 2),           # P2 write
    )(adj_hat_padded, x_p, w1, b1, w2)

    # ---- pass 2: out = log_softmax(relu(A_hat @ P2 + b2) @ W3 + b3) ---------
    out_pad = pl.pallas_call(
        _agg2_kernel,
        out_shape=jax.ShapeDtypeStruct((n_pad, c_pad), jnp.float32),
        grid_spec=pltpu.PrefetchScalarGridSpec(
            num_scalar_prefetch=0,
            grid=(nbi, nbk),
            in_specs=[
                pl.BlockSpec((tm, tk), lambda i, k: (i, k)),      # A_hat tile
                pl.BlockSpec((tk, h2), lambda i, k: (k, 0)),      # P2 panel
                pl.BlockSpec((1, h2), lambda i, k: (0, 0)),       # b2
                pl.BlockSpec((h2, c_pad), lambda i, k: (0, 0)),   # W3 (padded)
                pl.BlockSpec((1, c_pad), lambda i, k: (0, 0)),    # b3 (padded)
            ],
            out_specs=pl.BlockSpec((tm, c_pad), lambda i, k: (i, 0)),
            scratch_shapes=[pltpu.VMEM((tm, h2), jnp.float32)],
        ),
        compiler_params=pltpu.CompilerParams(
            dimension_semantics=("parallel", "arbitrary")),
        cost_estimate=pl.CostEstimate(
            flops=2 * n_pad * n_pad * h2 + 2 * n_pad * h2 * c_pad,
            transcendentals=n_pad * c_pad,
            bytes_accessed=n_pad * n_pad * 2
                           + nbi * n_pad * h2 * 2
                           + n_pad * c_pad * 4),
    )(adj_hat_padded, p2, b2, w3_p, b3_p)

    return out_pad[:n, :c]


# ---------------------------------------------------------------------------
# Plain-JAX glue + reference
# ---------------------------------------------------------------------------

def normalized_adjacency(edge_index, num_nodes):
    """Dense f32 D^{-1/2} (A + I) D^{-1/2} from edge_index [2, E] (PyG GCNConv).

    .set(1.0) dedups duplicate edges to a binary adjacency; jnp.maximum with
    the identity keeps pre-existing self-loops from stacking with the added I.
    """
    src = edge_index[0]
    dst = edge_index[1]
    a = jnp.zeros((num_nodes, num_nodes), jnp.float32).at[dst, src].set(1.0)
    a = jnp.maximum(a, jnp.eye(num_nodes, dtype=jnp.float32))
    deg = jnp.sum(a, axis=1)
    dinv = jnp.where(deg > 0.0, 1.0 / jnp.sqrt(deg), 0.0)
    return dinv[:, None] * a * dinv[None, :]


def pad_adjacency(adj_hat, n_pad=None):
    """Pad + cast A_hat to the streamed bf16 layout.  Call ONCE per graph
    (outside the per-forward jit path); the zero padding of rows AND columns
    is a correctness invariant (padded nodes must never pollute real rows)."""
    n = adj_hat.shape[0]
    if n_pad is None:
        n_pad = pad_to_tiles(n)
    return jnp.zeros((n_pad, n_pad), jnp.bfloat16).at[:n, :n].set(
        adj_hat.astype(jnp.bfloat16))


def init_params(key, num_features, hidden_dim, num_classes):
    """Deterministic synthetic parameters (shapes match the PyTorch module)."""
    k1, k2, k3 = jax.random.split(key, 3)
    h2 = hidden_dim // 2

    def glorot(k, fan_in, fan_out):
        scale = jnp.sqrt(6.0 / (fan_in + fan_out))
        return jax.random.uniform(k, (fan_in, fan_out), jnp.float32,
                                  minval=-scale, maxval=scale)

    w1 = glorot(k1, num_features, hidden_dim)
    b1 = jnp.zeros((1, hidden_dim), jnp.float32)
    w2 = glorot(k2, hidden_dim, h2)
    b2 = jnp.zeros((1, h2), jnp.float32)
    w3 = glorot(k3, h2, num_classes)
    b3 = jnp.zeros((1, num_classes), jnp.float32)
    return (w1, b1, w2, b2, w3, b3)


def _reference(x, adj_hat, params):
    w1, b1, w2, b2, w3, b3 = params
    h1 = jnp.maximum(adj_hat @ (x @ w1) + b1, 0.0)
    h2 = jnp.maximum(adj_hat @ (h1 @ w2) + b2, 0.0)
    return jax.nn.log_softmax(h2 @ w3 + b3, axis=1)


if __name__ == "__main__":
    NUM_NODES = 200          # pads to 256 -> 2 parallel i-blocks, 1 k-block
    NUM_FEATURES = 8
    HIDDEN_DIM = 32
    NUM_CLASSES = 4

    key = jax.random.PRNGKey(0)
    kx, kp = jax.random.split(key)

    # Node features (N, F)
    x = jax.random.normal(kx, (NUM_NODES, NUM_FEATURES), jnp.float32)

    # Deterministic bidirectional ring graph, edge_index shape [2, 2N]
    idx = jnp.arange(NUM_NODES, dtype=jnp.int32)
    nxt = (idx + 1) % NUM_NODES
    edge_index = jnp.stack(
        [jnp.concatenate([idx, nxt]), jnp.concatenate([nxt, idx])], axis=0)

    adj_hat = normalized_adjacency(edge_index, NUM_NODES)      # f32, reference
    adj_p = jax.block_until_ready(pad_adjacency(adj_hat))      # built once
    params = init_params(kp, NUM_FEATURES, HIDDEN_DIM, NUM_CLASSES)

    out = emotional_graph_nn(x, adj_p, params)
    out = jax.block_until_ready(out)

    assert out.shape == (NUM_NODES, NUM_CLASSES)
    # log_softmax rows must exp-sum to 1
    assert jnp.allclose(jnp.sum(jnp.exp(out), axis=1), 1.0, atol=1e-3)
    # parity vs. f32 plain-JAX reference (bf16 adjacency/panels -> loose tol)
    ref = _reference(x, adj_hat, params)
    assert jnp.allclose(out, ref, atol=1e-1), float(jnp.max(jnp.abs(out - ref)))
    print("KERNEL_OK")
</pallas_src>

<mosaic_0001>
module attributes {stable_mosaic.version = 11 : i64} {
  func.func @_agg1_kernel(%arg0: i32, %arg1: i32, %arg2: memref<128x256xbf16, #tpu.memory_space<vmem>>, %arg3: memref<256x8xf32, #tpu.memory_space<vmem>>, %arg4: memref<8x32xf32, #tpu.memory_space<vmem>>, %arg5: memref<1x32xf32, #tpu.memory_space<vmem>>, %arg6: memref<32x16xf32, #tpu.memory_space<vmem>>, %arg7: memref<128x16xbf16, #tpu.memory_space<vmem>>, %arg8: memref<128x32xf32, #tpu.memory_space<vmem>>) attributes {dimension_semantics = [#tpu.dimension_semantics<parallel>, #tpu.dimension_semantics<arbitrary>], iteration_bounds = array<i64: 2, 1>, scalar_prefetch = 0 : i64, scratch_operands = 1 : i64, tpu.core_type = #tpu.core_type<tc>, window_params = [{transform_indices = @transform_0, window_bounds = array<i64: 128, 256>}, {transform_indices = @transform_1, window_bounds = array<i64: 256, 8>}, {pipeline_mode = #tpu.pipeline_mode<synchronous>, transform_indices = @transform_2, window_bounds = array<i64: 8, 32>}, {pipeline_mode = #tpu.pipeline_mode<synchronous>, transform_indices = @transform_3, window_bounds = array<i64: 1, 32>}, {pipeline_mode = #tpu.pipeline_mode<synchronous>, transform_indices = @transform_4, window_bounds = array<i64: 32, 16>}, {transform_indices = @transform_5, window_bounds = array<i64: 128, 16>}]} {
    %c0_i32 = arith.constant 0 : i32
    %0 = arith.cmpi eq, %arg1, %c0_i32 : i32
    %1 = arith.extui %0 : i1 to i32
    %c0_i32_0 = arith.constant 0 : i32
    %2 = arith.cmpi ne, %1, %c0_i32_0 : i32
    scf.if %2 {
      %cst_13 = arith.constant 0.000000e+00 : f32
      %15 = vector.broadcast %cst_13 : f32 to vector<128x32xf32>
      %c0_14 = arith.constant 0 : index
      %c0_15 = arith.constant 0 : index
      %16 = vector.load %arg8[%c0_14, %c0_15] : memref<128x32xf32, #tpu.memory_space<vmem>>, vector<128x32xf32>
      tpu.vector_store %arg8[%c0_14, %c0_15], %15 {strides = array<i32>} : memref<128x32xf32, #tpu.memory_space<vmem>>, vector<128x32xf32>,
    } else {
    }
    %c0 = arith.constant 0 : index
    %c0_1 = arith.constant 0 : index
    %3 = vector.load %arg3[%c0, %c0_1] : memref<256x8xf32, #tpu.memory_space<vmem>>, vector<256x8xf32>
    %c0_2 = arith.constant 0 : index
    %c0_3 = arith.constant 0 : index
    %4 = vector.load %arg4[%c0_2, %c0_3] : memref<8x32xf32, #tpu.memory_space<vmem>>, vector<8x32xf32>
    %cst = arith.constant dense<0.000000e+00> : vector<256x32xf32>
    %5 = tpu.matmul %3, %4, %cst {dimension_numbers = #tpu.dot_dimension_numbers<[1], [0], [0], [1], [0, 0, 1, 1], [], []>} : vector<256x8xf32>, vector<8x32xf32>, vector<256x32xf32> -> vector<256x32xf32>
    %c0_4 = arith.constant 0 : index
    %c0_5 = arith.constant 0 : index
    %6 = vector.load %arg8[%c0_4, %c0_5] : memref<128x32xf32, #tpu.memory_space<vmem>>, vector<128x32xf32>
    %c0_6 = arith.constant 0 : index
    %c0_7 = arith.constant 0 : index
    %7 = vector.load %arg2[%c0_6, %c0_7] : memref<128x256xbf16, #tpu.memory_space<vmem>>, vector<128x256xbf16>
    %8 = arith.truncf %5 : vector<256x32xf32> to vector<256x32xbf16>
    %cst_8 = arith.constant dense<0.000000e+00> : vector<128x32xf32>
    %9 = tpu.matmul %7, %8, %cst_8 {dimension_numbers = #tpu.dot_dimension_numbers<[1], [0], [0], [1], [0, 0, 1, 1], [], []>} : vector<128x256xbf16>, vector<256x32xbf16>, vector<128x32xf32> -> vector<128x32xf32>
    %10 = arith.addf %6, %9 : vector<128x32xf32>
    %c0_9 = arith.constant 0 : index
    %c0_10 = arith.constant 0 : index
    %11 = vector.load %arg8[%c0_9, %c0_10] : memref<128x32xf32, #tpu.memory_space<vmem>>, vector<128x32xf32>
    tpu.vector_store %arg8[%c0_9, %c0_10], %10 {strides = array<i32>} : memref<128x32xf32, #tpu.memory_space<vmem>>, vector<128x32xf32>,
    %c0_i32_11 = arith.constant 0 : i32
    %12 = arith.cmpi eq, %arg1, %c0_i32_11 : i32
    %13 = arith.extui %12 : i1 to i32
    %c0_i32_12 = arith.constant 0 : i32
    %14 = arith.cmpi ne, %13, %c0_i32_12 : i32
    scf.if %14 {
      %c0_13 = arith.constant 0 : index
      %c0_14 = arith.constant 0 : index
      %15 = vector.load %arg8[%c0_13, %c0_14] : memref<128x32xf32, #tpu.memory_space<vmem>>, vector<128x32xf32>
      %c0_15 = arith.constant 0 : index
      %c0_16 = arith.constant 0 : index
      %16 = vector.load %arg5[%c0_15, %c0_16] : memref<1x32xf32, #tpu.memory_space<vmem>>, vector<1x32xf32>
      %17 = vector.broadcast %16 : vector<1x32xf32> to vector<128x32xf32>
      %18 = arith.addf %15, %17 : vector<128x32xf32>
      %cst_17 = arith.constant 0.000000e+00 : f32
      %19 = vector.broadcast %cst_17 : f32 to vector<128x32xf32>
      %20 = arith.maximumf %18, %19 : vector<128x32xf32>
      %c0_18 = arith.constant 0 : index
      %c0_19 = arith.constant 0 : index
      %21 = vector.load %arg6[%c0_18, %c0_19] : memref<32x16xf32, #tpu.memory_space<vmem>>, vector<32x16xf32>
      %cst_20 = arith.constant dense<0.000000e+00> : vector<128x16xf32>
      %22 = tpu.matmul %20, %21, %cst_20 {dimension_numbers = #tpu.dot_dimension_numbers<[1], [0], [0], [1], [0, 0, 1, 1], [], []>} : vector<128x32xf32>, vector<32x16xf32>, vector<128x16xf32> -> vector<128x16xf32>
      %23 = arith.truncf %22 : vector<128x16xf32> to vector<128x16xbf16>
      %c0_21 = arith.constant 0 : index
      %c0_22 = arith.constant 0 : index
      %24 = vector.load %arg7[%c0_21, %c0_22] : memref<128x16xbf16, #tpu.memory_space<vmem>>, vector<128x16xbf16>
      tpu.vector_store %arg7[%c0_21, %c0_22], %23 {strides = array<i32>} : memref<128x16xbf16, #tpu.memory_space<vmem>>, vector<128x16xbf16>,
    } else {
    }
    return
  }
  func.func @transform_0(%arg0: i32, %arg1: i32) -> (i32, i32) {
    %c0_i32 = arith.constant 0 : i32
    return %arg0, %arg1 : i32, i32
  }
  func.func @transform_1(%arg0: i32, %arg1: i32) -> (i32, i32) {
    %c0_i32 = arith.constant 0 : i32
    %c0_i32_0 = arith.constant 0 : i32
    return %arg1, %c0_i32 : i32, i32
  }
  func.func @transform_2(%arg0: i32, %arg1: i32) -> (i32, i32) {
    %c0_i32 = arith.constant 0 : i32
    %c0_i32_0 = arith.constant 0 : i32
    %c0_i32_1 = arith.constant 0 : i32
    return %c0_i32, %c0_i32_0 : i32, i32
  }
  func.func @transform_3(%arg0: i32, %arg1: i32) -> (i32, i32) {
    %c0_i32 = arith.constant 0 : i32
    %c0_i32_0 = arith.constant 0 : i32
    %c0_i32_1 = arith.constant 0 : i32
    return %c0_i32, %c0_i32_0 : i32, i32
  }
  func.func @transform_4(%arg0: i32, %arg1: i32) -> (i32, i32) {
    %c0_i32 = arith.constant 0 : i32
    %c0_i32_0 = arith.constant 0 : i32
    %c0_i32_1 = arith.constant 0 : i32
    return %c0_i32, %c0_i32_0 : i32, i32
  }
  func.func @transform_5(%arg0: i32, %arg1: i32) -> (i32, i32) {
    %c0_i32 = arith.constant 0 : i32
    %c0_i32_0 = arith.constant 0 : i32
    return %arg0, %c0_i32 : i32, i32
  }
}

module attributes {stable_mosaic.version = 11 : i64} {
  func.func @_agg2_kernel(%arg0: i32, %arg1: i32, %arg2: memref<128x256xbf16, #tpu.memory_space<vmem>>, %arg3: memref<256x16xbf16, #tpu.memory_space<vmem>>, %arg4: memref<1x16xf32, #tpu.memory_space<vmem>>, %arg5: memref<16x128xf32, #tpu.memory_space<vmem>>, %arg6: memref<1x128xf32, #tpu.memory_space<vmem>>, %arg7: memref<128x128xf32, #tpu.memory_space<vmem>>, %arg8: memref<128x16xf32, #tpu.memory_space<vmem>>) attributes {dimension_semantics = [#tpu.dimension_semantics<parallel>, #tpu.dimension_semantics<arbitrary>], iteration_bounds = array<i64: 2, 1>, scalar_prefetch = 0 : i64, scratch_operands = 1 : i64, tpu.core_type = #tpu.core_type<tc>, window_params = [{transform_indices = @transform_0, window_bounds = array<i64: 128, 256>}, {transform_indices = @transform_1, window_bounds = array<i64: 256, 16>}, {pipeline_mode = #tpu.pipeline_mode<synchronous>, transform_indices = @transform_2, window_bounds = array<i64: 1, 16>}, {pipeline_mode = #tpu.pipeline_mode<synchronous>, transform_indices = @transform_3, window_bounds = array<i64: 16, 128>}, {pipeline_mode = #tpu.pipeline_mode<synchronous>, transform_indices = @transform_4, window_bounds = array<i64: 1, 128>}, {transform_indices = @transform_5, window_bounds = array<i64: 128, 128>}]} {
    %c0_i32 = arith.constant 0 : i32
    %0 = arith.cmpi eq, %arg1, %c0_i32 : i32
    %1 = arith.extui %0 : i1 to i32
    %c0_i32_0 = arith.constant 0 : i32
    %2 = arith.cmpi ne, %1, %c0_i32_0 : i32
    scf.if %2 {
      %cst_10 = arith.constant 0.000000e+00 : f32
      %12 = vector.broadcast %cst_10 : f32 to vector<128x16xf32>
      %c0_11 = arith.constant 0 : index
      %c0_12 = arith.constant 0 : index
      %13 = vector.load %arg8[%c0_11, %c0_12] : memref<128x16xf32, #tpu.memory_space<vmem>>, vector<128x16xf32>
      tpu.vector_store %arg8[%c0_11, %c0_12], %12 {strides = array<i32>} : memref<128x16xf32, #tpu.memory_space<vmem>>, vector<128x16xf32>,
    } else {
    }
    %c0 = arith.constant 0 : index
    %c0_1 = arith.constant 0 : index
    %3 = vector.load %arg8[%c0, %c0_1] : memref<128x16xf32, #tpu.memory_space<vmem>>, vector<128x16xf32>
    %c0_2 = arith.constant 0 : index
    %c0_3 = arith.constant 0 : index
    %4 = vector.load %arg2[%c0_2, %c0_3] : memref<128x256xbf16, #tpu.memory_space<vmem>>, vector<128x256xbf16>
    %c0_4 = arith.constant 0 : index
    %c0_5 = arith.constant 0 : index
    %5 = vector.load %arg3[%c0_4, %c0_5] : memref<256x16xbf16, #tpu.memory_space<vmem>>, vector<256x16xbf16>
    %cst = arith.constant dense<0.000000e+00> : vector<128x16xf32>
    %6 = tpu.matmul %4, %5, %cst {dimension_numbers = #tpu.dot_dimension_numbers<[1], [0], [0], [1], [0, 0, 1, 1], [], []>} : vector<128x256xbf16>, vector<256x16xbf16>, vector<128x16xf32> -> vector<128x16xf32>
    %7 = arith.addf %3, %6 : vector<128x16xf32>
    %c0_6 = arith.constant 0 : index
    %c0_7 = arith.constant 0 : index
    %8 = vector.load %arg8[%c0_6, %c0_7] : memref<128x16xf32, #tpu.memory_space<vmem>>, vector<128x16xf32>
    tpu.vector_store %arg8[%c0_6, %c0_7], %7 {strides = array<i32>} : memref<128x16xf32, #tpu.memory_space<vmem>>, vector<128x16xf32>,
    %c0_i32_8 = arith.constant 0 : i32
    %9 = arith.cmpi eq, %arg1, %c0_i32_8 : i32
    %10 = arith.extui %9 : i1 to i32
    %c0_i32_9 = arith.constant 0 : i32
    %11 = arith.cmpi ne, %10, %c0_i32_9 : i32
    scf.if %11 {
      %c0_10 = arith.constant 0 : index
      %c0_11 = arith.constant 0 : index
      %12 = vector.load %arg8[%c0_10, %c0_11] : memref<128x16xf32, #tpu.memory_space<vmem>>, vector<128x16xf32>
      %c0_12 = arith.constant 0 : index
      %c0_13 = arith.constant 0 : index
      %13 = vector.load %arg4[%c0_12, %c0_13] : memref<1x16xf32, #tpu.memory_space<vmem>>, vector<1x16xf32>
      %14 = vector.broadcast %13 : vector<1x16xf32> to vector<128x16xf32>
      %15 = arith.addf %12, %14 : vector<128x16xf32>
      %cst_14 = arith.constant 0.000000e+00 : f32
      %16 = vector.broadcast %cst_14 : f32 to vector<128x16xf32>
      %17 = arith.maximumf %15, %16 : vector<128x16xf32>
      %c0_15 = arith.constant 0 : index
      %c0_16 = arith.constant 0 : index
      %18 = vector.load %arg5[%c0_15, %c0_16] : memref<16x128xf32, #tpu.memory_space<vmem>>, vector<16x128xf32>
      %cst_17 = arith.constant dense<0.000000e+00> : vector<128x128xf32>
      %19 = tpu.matmul %17, %18, %cst_17 {dimension_numbers = #tpu.dot_dimension_numbers<[1], [0], [0], [1], [0, 0, 1, 1], [], []>} : vector<128x16xf32>, vector<16x128xf32>, vector<128x128xf32> -> vector<128x128xf32>
      %c0_18 = arith.constant 0 : index
      %c0_19 = arith.constant 0 : index
      %20 = vector.load %arg6[%c0_18, %c0_19] : memref<1x128xf32, #tpu.memory_space<vmem>>, vector<1x128xf32>
      %21 = vector.broadcast %20 : vector<1x128xf32> to vector<128x128xf32>
      %22 = arith.addf %19, %21 : vector<128x128xf32>
      %cst_20 = arith.constant dense<0xFF800000> : vector<128xf32>
      %23 = vector.multi_reduction <maximumf>, %22, %cst_20 [1] : vector<128x128xf32> to vector<128xf32>
      %24 = vector.shape_cast %23 : vector<128xf32> to vector<128x1xf32>
      %25 = vector.broadcast %24 : vector<128x1xf32> to vector<128x128xf32>
      %26 = arith.subf %22, %25 : vector<128x128xf32>
      %27 = math.exp %26 : vector<128x128xf32>
      %cst_21 = arith.constant dense<0.000000e+00> : vector<128xf32>
      %28 = vector.multi_reduction <add>, %27, %cst_21 [1] : vector<128x128xf32> to vector<128xf32>
      %29 = vector.shape_cast %28 : vector<128xf32> to vector<128x1xf32>
      %30 = math.log %29 : vector<128x1xf32>
      %31 = vector.broadcast %30 : vector<128x1xf32> to vector<128x128xf32>
      %32 = arith.subf %26, %31 : vector<128x128xf32>
      %c0_22 = arith.constant 0 : index
      %c0_23 = arith.constant 0 : index
      %33 = vector.load %arg7[%c0_22, %c0_23] : memref<128x128xf32, #tpu.memory_space<vmem>>, vector<128x128xf32>
      tpu.vector_store %arg7[%c0_22, %c0_23], %32 {strides = array<i32>} : memref<128x128xf32, #tpu.memory_space<vmem>>, vector<128x128xf32>,
    } else {
    }
    return
  }
  func.func @transform_0(%arg0: i32, %arg1: i32) -> (i32, i32) {
    %c0_i32 = arith.constant 0 : i32
    return %arg0, %arg1 : i32, i32
  }
  func.func @transform_1(%arg0: i32, %arg1: i32) -> (i32, i32) {
    %c0_i32 = arith.constant 0 : i32
    %c0_i32_0 = arith.constant 0 : i32
    return %arg1, %c0_i32 : i32, i32
  }
  func.func @transform_2(%arg0: i32, %arg1: i32) -> (i32, i32) {
    %c0_i32 = arith.constant 0 : i32
    %c0_i32_0 = arith.constant 0 : i32
    %c0_i32_1 = arith.constant 0 : i32
    return %c0_i32, %c0_i32_0 : i32, i32
  }
  func.func @transform_3(%arg0: i32, %arg1: i32) -> (i32, i32) {
    %c0_i32 = arith.constant 0 : i32
    %c0_i32_0 = arith.constant 0 : i32
    %c0_i32_1 = arith.constant 0 : i32
    return %c0_i32, %c0_i32_0 : i32, i32
  }
  func.func @transform_4(%arg0: i32, %arg1: i32) -> (i32, i32) {
    %c0_i32 = arith.constant 0 : i32
    %c0_i32_0 = arith.constant 0 : i32
    %c0_i32_1 = arith.constant 0 : i32
    return %c0_i32, %c0_i32_0 : i32, i32
  }
  func.func @transform_5(%arg0: i32, %arg1: i32) -> (i32, i32) {
    %c0_i32 = arith.constant 0 : i32
    %c0_i32_0 = arith.constant 0 : i32
    return %arg0, %c0_i32 : i32, i32
  }
}

</mosaic_0001>

<bundles_post_ra>
// kernel: emotional_graph_nn.2
= control target key start
LH: loop header
LB: loop body
LE: loop exit
PB: predicated region body
PF: predicated region fallthrough
CT: control target
= control target key end

     0   :  { %s1760_s18 = smov 0   ;;  %s1762_s19 = smov 0   ;;  %s2064_s0 = inlined_call_operand.vmem [shape: bf16[256,256], index: 0, kind: input, shape index: {}]   ;;  %s2065_s1 = inlined_call_operand.vmem [shape: f32[256,8], index: 1, kind: input, shape index: {}]   ;;  %s2066_s2 = inlined_call_operand.vmem [shape: f32[8,32], index: 2, kind: input, shape index: {}]   ;;  %s2067_s3 = inlined_call_operand.vmem [shape: f32[1,32], index: 3, kind: input, shape index: {}]   ;;  %s2068_s4 = inlined_call_operand.vmem [shape: f32[32,16], index: 4, kind: input, shape index: {}]   ;;  %s2069_s5 = inlined_call_operand.vmem [shape: bf16[256,16], index: 5, kind: output, shape index: {}]  }
   0x1   :  { %s1764_s20 = smov 0  }
   0x2 LB: > { %s27_s21 = sadd.s32 1, %s1723_s19  ;;  %p1343_p0 = scmp.ge.s32.totalorder %s1727_s20, 1  ;;  %s1727_s20 = sphi %s1764_s20, %s15_s20   ;;  %s1723_s19 = sphi %s1762_s19, %s2071_s19   ;;  %s1719_s18 = sphi %s1760_s18, %s2070_s18  }
   0x3   : > { %p29_p1 = scmp.ge.s32.totalorder %s27_s21, 2  ;;  %p219_p2 = scmp.lt.s32.totalorder %s1727_s20, 3 }
   0x5   : > { %s2073_s21 = smov (%p29_p1, %s27_s21), 0  ;;  %p220_p3 = pnand %p1343_p0, %p219_p2 }
   0x6   : > { %v335_v0 = vld [vmem:[%s2066_s2] sm:$0xff] (!%p220_p3)  ;;  %vm336_vm0 = vcmask (!%p220_p3), 64512   ;;  %v304_v2 = vld [vmem:[%s2065_s1 + $0x8] sm:$0xff] (!%p220_p3)  ;;  %v305_v3 = vld [vmem:[%s2065_s1 + $0x10] sm:$0xff] (!%p220_p3)  ;;  %s1344_s25 = sshll.u32 (!%p220_p3), %s1719_s18, 4  ;;  %vm286_vm1 = vcmask (!%p220_p3), 261120  }
   0x7   : > { %223 = sbr.rel (%p220_p3) target bundleno = 791 (0x317), region = 40  ;;  %v303_v1 = vld [vmem:[%s2065_s1] sm:$0xff] (!%p220_p3)  ;;  %1566 = vmatprep.subr.mxu0 (!%p220_p3), %v335_v0  ;;  %v306_v4 = vld [vmem:[%s2065_s1 + $0x18] sm:$0xff] (!%p220_p3)  ;;  %v308_v6 = vld [vmem:[%s2065_s1 + $0x28] sm:$0xff] (!%p220_p3)  ;;  %p259_p4 = scmp.lt.s32.totalorder (!%p220_p3), %s1344_s25, 31  ;;  %vm1235_vm2 = vcmask (!%p220_p3), 125952  }
   0x8   : > { %1568 = vmatprep.mubr.msk.f32.mxu0 (!%p220_p3), %vm336_vm0, %v303_v1  ;;  %1567 = vmatpush3.msra.mxu0 (!%p220_p3), %v335_v0  ;;  %v307_v5 = vld [vmem:[%s2065_s1 + $0x20] sm:$0xff] (!%p220_p3)  ;;  %v309_v7 = vld [vmem:[%s2065_s1 + $0x30] sm:$0xff] (!%p220_p3)  ;;  %v310_v8 = vld [vmem:[%s2065_s1 + $0x38] sm:$0xff] (!%p220_p3) }
   0x9   : > { %1569 = vmatmul.mubr.msk.f32.vlgmr.msra.gmra.mrb[0].mxu0 (!%p220_p3), %vm336_vm0, %v304_v2  ;;  %v311_v9 = vld [vmem:[%s2065_s1 + $0x40] sm:$0xff] (!%p220_p3)  ;;  %v312_v10 = vld [vmem:[%s2065_s1 + $0x48] sm:$0xff] (!%p220_p3)  ;;  %v313_v11 = vld [vmem:[%s2065_s1 + $0x50] sm:$0xff] (!%p220_p3) }
   0xa   : > { %1571 = vmatprep.mubr.msk.f32.mxu0 (!%p220_p3), %vm336_vm0, %v305_v3  ;;  %v314_v12 = vld [vmem:[%s2065_s1 + $0x58] sm:$0xff] (!%p220_p3)  ;;  %v315_v13 = vld [vmem:[%s2065_s1 + $0x60] sm:$0xff] (!%p220_p3)  ;;  %v316_v14 = vld [vmem:[%s2065_s1 + $0x68] sm:$0xff] (!%p220_p3) }
   0xb   : > { %v317_v15 = vld [vmem:[%s2065_s1 + $0x70] sm:$0xff] (!%p220_p3)  ;;  %v318_v16 = vld [vmem:[%s2065_s1 + $0x78] sm:$0xff] (!%p220_p3)  ;;  %v319_v17 = vld [vmem:[%s2065_s1 + $0x80] sm:$0xff] (!%p220_p3) }
   0xc   : > { %v320_v18 = vld [vmem:[%s2065_s1 + $0x88] sm:$0xff] (!%p220_p3)  ;;  %v321_v19 = vld [vmem:[%s2065_s1 + $0x90] sm:$0xff] (!%p220_p3)  ;;  %v322_v20 = vld [vmem:[%s2065_s1 + $0x98] sm:$0xff] (!%p220_p3) }
   0xd   : > { %1572 = vmatmul.mubr.msk.f32.gmra.mrb[2].mxu0 (!%p220_p3), %vm336_vm0, %v306_v4  ;;  %v323_v21 = vld [vmem:[%s2065_s1 + $0xa0] sm:$0xff] (!%p220_p3)  ;;  %v324_v22 = vld [vmem:[%s2065_s1 + $0xa8] sm:$0xff] (!%p220_p3)  ;;  %v325_v23 = vld [vmem:[%s2065_s1 + $0xb0] sm:$0xff] (!%p220_p3) }
   0xe   : > { %1574 = vmatprep.mubr.msk.f32.mxu0 %vm336_vm0, %v307_v5  ;;  %v326_v24 = vld [vmem:[%s2065_s1 + $0xb8] sm:$0xff]  ;;  %v327_v25 = vld [vmem:[%s2065_s1 + $0xc0] sm:$0xff]  ;;  %v328_v26 = vld [vmem:[%s2065_s1 + $0xc8] sm:$0xff]  ;;  %s2075_s25 = smov (!%p259_p4, %s1344_s25), 31 }
   0xf   : > { %v329_v27 = vld [vmem:[%s2065_s1 + $0xd0] sm:$0xff]  ;;  %v330_v28 = vld [vmem:[%s2065_s1 + $0xd8] sm:$0xff]  ;;  %v331_v29 = vld [vmem:[%s2065_s1 + $0xe0] sm:$0xff]  ;;  %s1432_s26 = sshll.u32 %s2075_s25, 3  ;;  %s1348_s14 = sshll.u32 %s2075_s25, 2 }
  0x10   : > { %v332_v30 = vld [vmem:[%s2065_s1 + $0xe8] sm:$0xff]  ;;  %v333_v31 = vld [vmem:[%s2065_s1 + $0xf0] sm:$0xff]  ;;  %v334_v32 = vld [vmem:[%s2065_s1 + $0xf8] sm:$0xff]  ;;  %s1918_s29 = scalar_lea.vmem %s2064_s0, %s1432_s26  ;;  %s2021_s17 = scalar_lea.vmem %s2069_s5, %s1348_s14 }
  0x11   : > { %1575 = vmatmul.mubr.msk.f32.gmra.mrb[4].mxu0 %vm336_vm0, %v308_v6  ;;  %v1683_v33 = vld [vmem:[%s1918_s29 + $0x4] ss:$8 sps:$4 sm:$0xff]  }
  0x12   : > { %1577 = vmatprep.mubr.msk.f32.mxu0 %vm336_vm0, %v309_v7  ;;  %818 = vmatprep.mubr.bf16.mxu1 %v1683_v33  ;;  %v974_v34 = vld [vmem:[%s2068_s4] sm:$0xff]  ;;  %v975_v35 = vld [vmem:[%s2068_s4 + $0x8] sm:$0xff] }
  0x13   : > { %v1648_v36 = vpack.c.bf16 %v975_v35, %v974_v34  ;;  %v1701_v33 = vld [vmem:[%s1918_s29 + $0x60] ss:$8 sps:$4 sm:$0xff]   ;;  %v1702_v34 = vld [vmem:[%s1918_s29 + $0x74] ss:$8 sps:$4 sm:$0xff]   ;;  %v1704_v35 = vld [vmem:[%s1918_s29 + $0x70] ss:$8 sps:$4 sm:$0xff]  }
  0x15   : > { %1578 = vmatmul.mubr.msk.f32.gmra.mrb[6].mxu0 %vm336_vm0, %v310_v8  ;;  %1649 = vmatprep.subr.bf16.mxu0 %v1648_v36 }
  0x16   : > { %1580 = vmatprep.mubr.msk.f32.mxu0 %vm336_vm0, %v311_v9  ;;  %1651 = vmatpush3.bf16.msra.mxu0 %v1648_v36  ;;  %v1729_v36 = vmov 0.0  }
  0x17   : > { %287 = vst.msk [vmem:[#allocation2] sm:$0xff] %vm286_vm1, %v1729_v36  ;;  %288 = vst.msk [vmem:[#allocation2 + $0x8] sm:$0xff] %vm286_vm1, %v1729_v36 }
  0x18   : > { %289 = vst.msk [vmem:[#allocation2 + $0x10] sm:$0xff] %vm286_vm1, %v1729_v36  ;;  %290 = vst.msk [vmem:[#allocation2 + $0x18] sm:$0xff] %vm286_vm1, %v1729_v36 }
  0x19   : > { %1581 = vmatmul.mubr.msk.f32.gmra.mrb[8].mxu0 %vm336_vm0, %v312_v10  ;;  %291 = vst.msk [vmem:[#allocation2 + $0x20] sm:$0xff] %vm286_vm1, %v1729_v36  ;;  %292 = vst.msk [vmem:[#allocation2 + $0x28] sm:$0xff] %vm286_vm1, %v1729_v36 }
  0x1a   : > { %1583 = vmatprep.mubr.msk.f32.mxu0 %vm336_vm0, %v313_v11  ;;  %293 = vst.msk [vmem:[#allocation2 + $0x30] sm:$0xff] %vm286_vm1, %v1729_v36  ;;  %294 = vst.msk [vmem:[#allocation2 + $0x38] sm:$0xff] %vm286_vm1, %v1729_v36 }
  0x1b   : > { %295 = vst.msk [vmem:[#allocation2 + $0x40] sm:$0xff] %vm286_vm1, %v1729_v36  ;;  %296 = vst.msk [vmem:[#allocation2 + $0x48] sm:$0xff] %vm286_vm1, %v1729_v36 }
  0x1c   : > { %297 = vst.msk [vmem:[#allocation2 + $0x50] sm:$0xff] %vm286_vm1, %v1729_v36  ;;  %298 = vst.msk [vmem:[#allocation2 + $0x58] sm:$0xff] %vm286_vm1, %v1729_v36 }
  0x1d   : > { %1584 = vmatmul.mubr.msk.f32.gmra.mrb[10].mxu0 %vm336_vm0, %v314_v12  ;;  %299 = vst.msk [vmem:[#allocation2 + $0x60] sm:$0xff] %vm286_vm1, %v1729_v36  ;;  %300 = vst.msk [vmem:[#allocation2 + $0x68] sm:$0xff] %vm286_vm1, %v1729_v36 }
  0x1e   : > { %1586 = vmatprep.mubr.msk.f32.mxu0 %vm336_vm0, %v315_v13  ;;  %301 = vst.msk [vmem:[#allocation2 + $0x70] sm:$0xff] %vm286_vm1, %v1729_v36  ;;  %302 = vst.msk [vmem:[#allocation2 + $0x78] sm:$0xff] %vm286_vm1, %v1729_v36 }
  0x21   : > { %1587 = vmatmul.mubr.msk.f32.gmra.mrb[12].mxu0 %vm336_vm0, %v316_v14 }
  0x22   : > { %1589 = vmatprep.mubr.msk.f32.mxu0 %vm336_vm0, %v317_v15 }
  0x25   : > { %1590 = vmatmul.mubr.msk.f32.gmra.mrb[14].mxu0 %vm336_vm0, %v318_v16 }
  0x26   : > { %1592 = vmatprep.mubr.msk.f32.mxu0 %vm336_vm0, %v319_v17 }
  0x29   : > { %1593 = vmatmul.mubr.msk.f32.gmra.mrb[16].mxu0 %vm336_vm0, %v320_v18 }
  0x2a   : > { %1595 = vmatprep.mubr.msk.f32.mxu0 %vm336_vm0, %v321_v19 }
  0x2d   : > { %1596 = vmatmul.mubr.msk.f32.gmra.mrb[18].mxu0 %vm336_vm0, %v322_v20 }
  0x2e   : > { %1598 = vmatprep.mubr.msk.f32.mxu0 %vm336_vm0, %v323_v21  ;;  %v1681_v21 = vld [vmem:[%s1918_s29] ss:$8 sps:$4 sm:$0xff]  }
  0x31   : > { %1599 = vmatmul.mubr.msk.f32.gmra.mrb[20].mxu0 %vm336_vm0, %v324_v22  ;;  %v1684_v22 = vld [vmem:[%s1918_s29 + $0x14] ss:$8 sps:$4 sm:$0xff]  }
  0x32   : > { %1601 = vmatprep.mubr.msk.f32.mxu0 %vm336_vm0, %v325_v23  ;;  %v1686_v23 = vld [vmem:[%s1918_s29 + $0x10] ss:$8 sps:$4 sm:$0xff]  }
  0x35   : > { %1602 = vmatmul.mubr.msk.f32.gmra.mrb[22].mxu0 %vm336_vm0, %v326_v24  ;;  %v1687_v24 = vld [vmem:[%s1918_s29 + $0x24] ss:$8 sps:$4 sm:$0xff]  }
  0x36   : > { %1604 = vmatprep.mubr.msk.f32.mxu0 %vm336_vm0, %v327_v25  ;;  %v1689_v25 = vld [vmem:[%s1918_s29 + $0x20] ss:$8 sps:$4 sm:$0xff]  }
  0x39   : > { %1605 = vmatmul.mubr.msk.f32.gmra.mrb[24].mxu0 %vm336_vm0, %v328_v26  ;;  %v1690_v26 = vld [vmem:[%s1918_s29 + $0x34] ss:$8 sps:$4 sm:$0xff]  }
  0x3a   : > { %1607 = vmatprep.mubr.msk.f32.mxu0 %vm336_vm0, %v329_v27  ;;  %v1692_v27 = vld [vmem:[%s1918_s29 + $0x30] ss:$8 sps:$4 sm:$0xff]  }
  0x3d   : > { %1608 = vmatmul.mubr.msk.f32.gmra.mrb[26].mxu0 %vm336_vm0, %v330_v28  ;;  %v1693_v28 = vld [vmem:[%s1918_s29 + $0x44] ss:$8 sps:$4 sm:$0xff]  }
  0x3e   : > { %1610 = vmatprep.mubr.msk.f32.mxu0 %vm336_vm0, %v331_v29  ;;  %v1695_v29 = vld [vmem:[%s1918_s29 + $0x40] ss:$8 sps:$4 sm:$0xff]  }
  0x41   : > { %1611 = vmatmul.mubr.msk.f32.gmra.mrb[28].mxu0 %vm336_vm0, %v332_v30  ;;  %v1696_v30 = vld [vmem:[%s1918_s29 + $0x54] ss:$8 sps:$4 sm:$0xff]  }
  0x42   : > { %1613 = vmatprep.mubr.msk.f32.mxu0 %vm336_vm0, %v333_v31  ;;  %v1698_v31 = vld [vmem:[%s1918_s29 + $0x50] ss:$8 sps:$4 sm:$0xff]  }
  0x45   : > { %1614 = vmatmul.mubr.msk.f32.gmra.mrb[30].mxu0 %vm336_vm0, %v334_v32  ;;  %v1699_v32 = vld [vmem:[%s1918_s29 + $0x64] ss:$8 sps:$4 sm:$0xff]  }
  0xdc   : > { %v1570_v37 = vpop.f32.mrb[0].mxu0 }
  0xdd   : > { %v499_v38 = vpop.f32.mrb[1].mxu0 }
  0xde   : > { %v690_v39 = vpack.c.bf16 %v1570_v37, %v499_v38  ;;  %v976_v37 = vld [vmem:[%s2068_s4 + $0x10] sm:$0xff]  ;;  %v977_v38 = vld [vmem:[%s2068_s4 + $0x18] sm:$0xff] }
  0xe0   : > { %v1573_v40 = vpop.f32.mrb[2].mxu0 }
  0xe1   : > { %v509_v41 = vpop.f32.mrb[3].mxu0 }
  0xe2   : > { %v691_v42 = vpack.c.bf16 %v1573_v40, %v509_v41  ;;  %v658_v41 = vld [vmem:[#allocation2] sm:$0xff] }
  0xe4   : > { %v1576_v43 = vpop.f32.mrb[4].mxu0 }
  0xe5   : > { %v519_v44 = vpop.f32.mrb[5].mxu0 }
  0xe6   : > { %v692_v45 = vpack.c.bf16 %v1576_v43, %v519_v44 }
  0xe8   : > { %v1579_v46 = vpop.f32.mrb[6].mxu0 }
  0xe9   : > { %v529_v47 = vpop.f32.mrb[7].mxu0 }
  0xea   : > { %v693_v48 = vpack.c.bf16 %v1579_v46, %v529_v47 }
  0xec   : > { %v1582_v49 = vpop.f32.mrb[8].mxu0 }
  0xed   : > { %v539_v50 = vpop.f32.mrb[9].mxu0 }
  0xee   : > { %v694_v51 = vpack.c.bf16 %v1582_v49, %v539_v50 }
  0xf0   : > { %v1585_v52 = vpop.f32.mrb[10].mxu0 }
  0xf1   : > { %v549_v53 = vpop.f32.mrb[11].mxu0 }
  0xf2   : > { %v695_v54 = vpack.c.bf16 %v1585_v52, %v549_v53 }
  0xf4   : > { %v1588_v55 = vpop.f32.mrb[12].mxu0 }
  0xf5   : > { %v559_v56 = vpop.f32.mrb[13].mxu0 }
  0xf6   : > { %v696_v57 = vpack.c.bf16 %v1588_v55, %v559_v56  ;;  %v661_v55 = vld [vmem:[#allocation2 + $0x18] sm:$0xff] }
  0xf8   : > { %v1591_v58 = vpop.f32.mrb[14].mxu0 }
  0xf9   : > { %v569_v59 = vpop.f32.mrb[15].mxu0 }
  0xfa   : > { %v697_v60 = vpack.c.bf16 %v1591_v58, %v569_v59 }
  0xfc   : > { %v1594_v61 = vpop.f32.mrb[16].mxu0 }
  0xfd   : > { %v579_v62 = vpop.f32.mrb[17].mxu0 }
  0xfe   : > { %v698_v63 = vpack.c.bf16 %v1594_v61, %v579_v62 }
 0x100   : > { %v1597_v0 = vpop.f32.mrb[18].mxu0  ;;  %1482 = vmatprep.subr.bf16.mxu1 %v698_v63 }
 0x101   : > { %v589_v1 = vpop.f32.mrb[19].mxu0  ;;  %1483 = vmatpush3.bf16.msra.mxu1 %v690_v39  ;;  %v1652_v39 = vpack.c.bf16 %v977_v38, %v976_v37 }
 0x102   : > { %v699_v2 = vpack.c.bf16 %v1597_v0, %v589_v1 }
 0x103   : > { %1653 = vmatprep.subr.bf16.mxu0 %v1652_v39 }
 0x104   : > { %v1600_v3 = vpop.f32.mrb[20].mxu0  ;;  %1484 = vmatprep.subr.bf16.mxu1 %v699_v2  ;;  %1655 = vmatpush3.bf16.msra.mxu0 %v1652_v39 }
 0x105   : > { %v599_v4 = vpop.f32.mrb[21].mxu0  ;;  %1485 = vmatpush3.bf16.msra.mxu1 %v691_v42 }
 0x106   : > { %v700_v5 = vpack.c.bf16 %v1600_v3, %v599_v4  ;;  %v662_v3 = vld [vmem:[#allocation2 + $0x20] sm:$0xff] }
 0x108   : > { %v1603_v6 = vpop.f32.mrb[22].mxu0  ;;  %1486 = vmatprep.subr.bf16.mxu1 %v700_v5 }
 0x109   : > { %v609_v7 = vpop.f32.mrb[23].mxu0  ;;  %1487 = vmatpush3.bf16.msra.mxu1 %v692_v45  ;;  %v659_v45 = vld [vmem:[#allocation2 + $0x8] sm:$0xff] }
 0x10a   : > { %v701_v8 = vpack.c.bf16 %v1603_v6, %v609_v7 }
 0x10c   : > { %v1606_v9 = vpop.f32.mrb[24].mxu0  ;;  %1488 = vmatprep.subr.bf16.mxu1 %v701_v8  ;;  %v663_v8 = vld [vmem:[#allocation2 + $0x28] sm:$0xff] }
 0x10d   : > { %v619_v10 = vpop.f32.mrb[25].mxu0  ;;  %1489 = vmatpush3.bf16.msra.mxu1 %v693_v48 }
 0x10e   : > { %v702_v11 = vpack.c.bf16 %v1606_v9, %v619_v10 }
 0x110   : > { %v1609_v12 = vpop.f32.mrb[26].mxu0  ;;  %1490 = vmatprep.subr.bf16.mxu1 %v702_v11 }
 0x111   : > { %v629_v13 = vpop.f32.mrb[27].mxu0  ;;  %1491 = vmatpush3.bf16.msra.mxu1 %v694_v51  ;;  %v660_v51 = vld [vmem:[#allocation2 + $0x10] sm:$0xff] }
 0x112   : > { %v703_v14 = vpack.c.bf16 %v1609_v12, %v629_v13 }
 0x114   : > { %v1612_v15 = vpop.f32.mrb[28].mxu0  ;;  %1492 = vmatprep.subr.bf16.mxu1 %v703_v14 }
 0x115   : > { %v639_v16 = vpop.f32.mrb[29].mxu0  ;;  %1493 = vmatpush3.bf16.msra.mxu1 %v695_v54 }
 0x116   : > { %v704_v17 = vpack.c.bf16 %v1612_v15, %v639_v16 }
 0x118   : > { %v1615_v18 = vpop.f32.mrb[30].mxu0  ;;  %1494 = vmatprep.subr.bf16.mxu1 %v704_v17 }
 0x119   : > { %v649_v19 = vpop.f32.mrb[31].mxu0  ;;  %1495 = vmatpush3.bf16.msra.mxu1 %v696_v57  ;;  %v1969_v57 = vld [vmem:[%s2067_s3] ss:$0 sm:$0xff] }
 0x11a   : > { %v705_v20 = vpack.c.bf16 %v1615_v18, %v649_v19  ;;  %v664_v19 = vld [vmem:[#allocation2 + $0x30] sm:$0xff] }
 0x11c   : > { %1496 = vmatprep.subr.bf16.mxu1 %v705_v20 }
 0x11d   : > { %1497 = vmatpush3.bf16.msra.mxu1 %v697_v60 }
 0x120   : > { %819 = vmatmul.mubr.bf16.vlgmr.msra.gmra.mrb[0].mxu1 %v1681_v21 }
 0x121   : > { %826 = vmatprep.mubr.bf16.mxu1 %v1684_v22 }
 0x128   : > { %827 = vmatmul.mubr.bf16.gmra.mrb[4].mxu1 %v1686_v23 }
 0x129   : > { %834 = vmatprep.mubr.bf16.mxu1 %v1687_v24  ;;  %v665_v24 = vld [vmem:[#allocation2 + $0x38] sm:$0xff] }
 0x130   : > { %835 = vmatmul.mubr.bf16.gmra.mrb[8].mxu1 %v1689_v25 }
 0x131   : > { %842 = vmatprep.mubr.bf16.mxu1 %v1690_v26 }
 0x138   : > { %843 = vmatmul.mubr.bf16.gmra.mrb[12].mxu1 %v1692_v27 }
 0x139   : > { %850 = vmatprep.mubr.bf16.mxu1 %v1693_v28 }
 0x140   : > { %851 = vmatmul.mubr.bf16.gmra.mrb[16].mxu1 %v1695_v29 }
 0x141   : > { %858 = vmatprep.mubr.bf16.mxu1 %v1696_v30 }
 0x148   : > { %859 = vmatmul.mubr.bf16.gmra.mrb[20].mxu1 %v1698_v31 }
 0x149   : > { %866 = vmatprep.mubr.bf16.mxu1 %v1699_v32 }
 0x150   : > { %867 = vmatmul.mubr.bf16.gmra.mrb[24].mxu1 %v1701_v33 }
 0x151   : > { %874 = vmatprep.mubr.bf16.mxu1 %v1702_v34 }
 0x158   : > { %875 = vmatmul.mubr.bf16.gmra.mrb[28].mxu1 %v1704_v35  ;;  %v666_v35 = vld [vmem:[#allocation2 + $0x40] sm:$0xff] }
 0x1f3   : > { %v1498_v40 = vpop.f32.mrb[0].mxu1 }
 0x1f4   : > { %v1499_v42 = vpop.f32.mrb[1].mxu1 }
 0x1f5   : > { %v1500_v43 = vadd.f32 %v1499_v42, %v1498_v40  ;;  %v1501_v44 = vpop.f32.mrb[2].mxu1  ;;  %v667_v40 = vld [vmem:[#allocation2 + $0x48] sm:$0xff] }
 0x1f6   : > { %v1502_v46 = vpop.f32.mrb[3].mxu1 }
 0x1f7   : > { %v883_v47 = vadd.f32 %v1500_v43, %v658_v41  ;;  %v1503_v48 = vadd.f32 %v1502_v46, %v1501_v44 }
 0x1f9   : > { %900 = vst.msk [vmem:[#allocation2] sm:$0xff] %vm286_vm1, %v883_v47  ;;  %v884_v49 = vadd.f32 %v1503_v48, %v659_v45 }
 0x1fb   : > { %901 = vst.msk [vmem:[#allocation2 + $0x8] sm:$0xff] %vm286_vm1, %v884_v49  ;;  %v1504_v50 = vpop.f32.mrb[4].mxu1 }
 0x1fc   : > { %v1505_v52 = vpop.f32.mrb[5].mxu1 }
 0x1fd   : > { %v1506_v53 = vadd.f32 %v1505_v52, %v1504_v50  ;;  %v1507_v54 = vpop.f32.mrb[6].mxu1 }
 0x1fe   : > { %v1508_v56 = vpop.f32.mrb[7].mxu1 }
 0x1ff   : > { %v885_v58 = vadd.f32 %v1506_v53, %v660_v51  ;;  %v1509_v59 = vadd.f32 %v1508_v56, %v1507_v54  ;;  %v668_v51 = vld [vmem:[#allocation2 + $0x50] sm:$0xff]  ;;  %v669_v56 = vld [vmem:[#allocation2 + $0x58] sm:$0xff] }
 0x200   : > { %v919_v60 = vld [vmem:[#allocation2] sm:$0xff] }
 0x201   : > { %902 = vst.msk [vmem:[#allocation2 + $0x10] sm:$0xff] %vm286_vm1, %v885_v58  ;;  %v886_v61 = vadd.f32 %v1509_v59, %v661_v55  ;;  %v942_v62 = vadd.f32 %v1969_v57, %v919_v60 }
 0x202   : > { %v920_v63 = vld [vmem:[#allocation2 + $0x8] sm:$0xff] }
 0x203   : > { %903 = vst.msk [vmem:[#allocation2 + $0x18] sm:$0xff] %vm286_vm1, %v886_v61  ;;  %v1510_v0 = vpop.f32.mrb[8].mxu1  ;;  %v958_v1 = vmax.f32 %v942_v62, 0.0  ;;  %v943_v2 = vadd.f32 %v1969_v57, %v920_v63 }
 0x204   : > { %v1511_v4 = vpop.f32.mrb[9].mxu1 }
 0x205   : > { %v1512_v5 = vadd.f32 %v1511_v4, %v1510_v0  ;;  %v1513_v6 = vpop.f32.mrb[10].mxu1  ;;  %1624 = vmatprep.mubr.msk.f32.mxu0 %vm286_vm1, %v958_v1  ;;  %v959_v7 = vmax.f32 %v943_v2, 0.0  ;;  %v670_v4 = vld [vmem:[#allocation2 + $0x60] sm:$0xff] }
 0x206   : > { %v1514_v9 = vpop.f32.mrb[11].mxu1 }
 0x207   : > { %v887_v10 = vadd.f32 %v1512_v5, %v662_v3  ;;  %v1515_v11 = vadd.f32 %v1514_v9, %v1513_v6  ;;  %1625 = vmatmul.mubr.msk.f32.vlgmr.msra.gmra.mrb[32].mxu0 %vm286_vm1, %v959_v7  ;;  %v671_v9 = vld [vmem:[#allocation2 + $0x68] sm:$0xff] }
 0x208   : > { %v921_v12 = vld [vmem:[#allocation2 + $0x10] sm:$0xff] }
 0x209   : > { %904 = vst.msk [vmem:[#allocation2 + $0x20] sm:$0xff] %vm286_vm1, %v887_v10  ;;  %v888_v13 = vadd.f32 %v1515_v11, %v663_v8  ;;  %v944_v14 = vadd.f32 %v1969_v57, %v921_v12 }
 0x20a   : > { %v922_v15 = vld [vmem:[#allocation2 + $0x18] sm:$0xff] }
 0x20b   : > { %905 = vst.msk [vmem:[#allocation2 + $0x28] sm:$0xff] %vm286_vm1, %v888_v13  ;;  %v1516_v16 = vpop.f32.mrb[12].mxu1  ;;  %v960_v17 = vmax.f32 %v944_v14, 0.0  ;;  %v945_v18 = vadd.f32 %v1969_v57, %v922_v15 }
 0x20c   : > { %v1517_v20 = vpop.f32.mrb[13].mxu1 }
 0x20d   : > { %v1518_v21 = vadd.f32 %v1517_v20, %v1516_v16  ;;  %v1519_v22 = vpop.f32.mrb[14].mxu1  ;;  %1627 = vmatprep.mubr.msk.f32.mxu0 %vm286_vm1, %v960_v17  ;;  %v961_v23 = vmax.f32 %v945_v18, 0.0  ;;  %v672_v20 = vld [vmem:[#allocation2 + $0x70] sm:$0xff] }
 0x20e   : > { %v1520_v25 = vpop.f32.mrb[15].mxu1 }
 0x20f   : > { %v889_v26 = vadd.f32 %v1518_v21, %v664_v19  ;;  %v1521_v27 = vadd.f32 %v1520_v25, %v1519_v22  ;;  %1628 = vmatmul.mubr.msk.f32.gmra.mrb[34].mxu0 %vm286_vm1, %v961_v23  ;;  %v673_v25 = vld [vmem:[#allocation2 + $0x78] sm:$0xff] }
 0x210   : > { %v923_v28 = vld [vmem:[#allocation2 + $0x20] sm:$0xff] }
 0x211   : > { %906 = vst.msk [vmem:[#allocation2 + $0x30] sm:$0xff] %vm286_vm1, %v889_v26  ;;  %v890_v29 = vadd.f32 %v1521_v27, %v665_v24  ;;  %v946_v30 = vadd.f32 %v1969_v57, %v923_v28 }
 0x212   : > { %v924_v31 = vld [vmem:[#allocation2 + $0x28] sm:$0xff] }
 0x213   : > { %907 = vst.msk [vmem:[#allocation2 + $0x38] sm:$0xff] %vm286_vm1, %v890_v29  ;;  %v1522_v32 = vpop.f32.mrb[16].mxu1  ;;  %v962_v33 = vmax.f32 %v946_v30, 0.0  ;;  %v947_v34 = vadd.f32 %v1969_v57, %v924_v31 }
 0x214   : > { %v1523_v36 = vpop.f32.mrb[17].mxu1 }
 0x215   : > { %v1524_v37 = vadd.f32 %v1523_v36, %v1522_v32  ;;  %v1525_v38 = vpop.f32.mrb[18].mxu1  ;;  %1630 = vmatprep.mubr.msk.f32.mxu0 %vm286_vm1, %v962_v33  ;;  %v963_v39 = vmax.f32 %v947_v34, 0.0 }
 0x216   : > { %v1526_v41 = vpop.f32.mrb[19].mxu1 }
 0x217   : > { %v891_v42 = vadd.f32 %v1524_v37, %v666_v35  ;;  %v1527_v43 = vadd.f32 %v1526_v41, %v1525_v38  ;;  %1631 = vmatmul.mubr.msk.f32.gmra.mrb[36].mxu0 %vm286_vm1, %v963_v39 }
 0x218   : > { %v925_v44 = vld [vmem:[#allocation2 + $0x30] sm:$0xff] }
 0x219   : > { %908 = vst.msk [vmem:[#allocation2 + $0x40] sm:$0xff] %vm286_vm1, %v891_v42  ;;  %v892_v45 = vadd.f32 %v1527_v43, %v667_v40  ;;  %v948_v46 = vadd.f32 %v1969_v57, %v925_v44 }
 0x21a   : > { %v926_v47 = vld [vmem:[#allocation2 + $0x38] sm:$0xff] }
 0x21b   : > { %909 = vst.msk [vmem:[#allocation2 + $0x48] sm:$0xff] %vm286_vm1, %v892_v45  ;;  %v1528_v48 = vpop.f32.mrb[20].mxu1  ;;  %v964_v49 = vmax.f32 %v948_v46, 0.0  ;;  %v949_v50 = vadd.f32 %v1969_v57, %v926_v47 }
 0x21c   : > { %v1529_v52 = vpop.f32.mrb[21].mxu1 }
 0x21d   : > { %v1530_v53 = vadd.f32 %v1529_v52, %v1528_v48  ;;  %v1531_v54 = vpop.f32.mrb[22].mxu1  ;;  %1633 = vmatprep.mubr.msk.f32.mxu0 %vm286_vm1, %v964_v49  ;;  %v965_v55 = vmax.f32 %v949_v50, 0.0 }
 0x21e   : > { %v1532_v58 = vpop.f32.mrb[23].mxu1 }
 0x21f   : > { %v893_v59 = vadd.f32 %v1530_v53, %v668_v51  ;;  %v1533_v60 = vadd.f32 %v1532_v58, %v1531_v54  ;;  %1634 = vmatmul.mubr.msk.f32.gmra.mrb[38].mxu0 %vm286_vm1, %v965_v55 }
 0x220   : > { %v927_v61 = vld [vmem:[#allocation2 + $0x40] sm:$0xff] }
 0x221   : > { %910 = vst.msk [vmem:[#allocation2 + $0x50] sm:$0xff] %vm286_vm1, %v893_v59  ;;  %v894_v62 = vadd.f32 %v1533_v60, %v669_v56  ;;  %v950_v63 = vadd.f32 %v1969_v57, %v927_v61 }
 0x222   : > { %v928_v0 = vld [vmem:[#allocation2 + $0x48] sm:$0xff] }
 0x223   : > { %911 = vst.msk [vmem:[#allocation2 + $0x58] sm:$0xff] %vm286_vm1, %v894_v62  ;;  %v1534_v1 = vpop.f32.mrb[24].mxu1  ;;  %v966_v2 = vmax.f32 %v950_v63, 0.0  ;;  %v951_v3 = vadd.f32 %v1969_v57, %v928_v0 }
 0x224   : > { %v1535_v5 = vpop.f32.mrb[25].mxu1 }
 0x225   : > { %v1536_v6 = vadd.f32 %v1535_v5, %v1534_v1  ;;  %v1537_v7 = vpop.f32.mrb[26].mxu1  ;;  %1636 = vmatprep.mubr.msk.f32.mxu0 %vm286_vm1, %v966_v2  ;;  %v967_v8 = vmax.f32 %v951_v3, 0.0 }
 0x226   : > { %v1538_v10 = vpop.f32.mrb[27].mxu1 }
 0x227   : > { %v895_v11 = vadd.f32 %v1536_v6, %v670_v4  ;;  %v1539_v12 = vadd.f32 %v1538_v10, %v1537_v7  ;;  %1637 = vmatmul.mubr.msk.f32.gmra.mrb[40].mxu0 %vm286_vm1, %v967_v8 }
 0x228   : > { %v929_v13 = vld [vmem:[#allocation2 + $0x50] sm:$0xff] }
 0x229   : > { %912 = vst.msk [vmem:[#allocation2 + $0x60] sm:$0xff] %vm286_vm1, %v895_v11  ;;  %v896_v14 = vadd.f32 %v1539_v12, %v671_v9  ;;  %v952_v15 = vadd.f32 %v1969_v57, %v929_v13 }
 0x22a   : > { %v930_v16 = vld [vmem:[#allocation2 + $0x58] sm:$0xff] }
 0x22b   : > { %913 = vst.msk [vmem:[#allocation2 + $0x68] sm:$0xff] %vm286_vm1, %v896_v14  ;;  %v1540_v17 = vpop.f32.mrb[28].mxu1  ;;  %v968_v18 = vmax.f32 %v952_v15, 0.0  ;;  %v953_v19 = vadd.f32 %v1969_v57, %v930_v16 }
 0x22c   : > { %v1541_v21 = vpop.f32.mrb[29].mxu1 }
 0x22d   : > { %v1542_v22 = vadd.f32 %v1541_v21, %v1540_v17  ;;  %v1543_v23 = vpop.f32.mrb[30].mxu1  ;;  %1639 = vmatprep.mubr.msk.f32.mxu0 %vm286_vm1, %v968_v18  ;;  %v969_v24 = vmax.f32 %v953_v19, 0.0 }
 0x22e   : > { %v1544_v26 = vpop.f32.mrb[31].mxu1 }
 0x22f   : > { %v897_v27 = vadd.f32 %v1542_v22, %v672_v20  ;;  %v1545_v28 = vadd.f32 %v1544_v26, %v1543_v23  ;;  %1640 = vmatmul.mubr.msk.f32.gmra.mrb[42].mxu0 %vm286_vm1, %v969_v24 }
 0x230   : > { %v931_v29 = vld [vmem:[#allocation2 + $0x60] sm:$0xff] }
 0x231   : > { %914 = vst.msk [vmem:[#allocation2 + $0x70] sm:$0xff] %vm286_vm1, %v897_v27  ;;  %v898_v30 = vadd.f32 %v1545_v28, %v673_v25  ;;  %v954_v31 = vadd.f32 %v1969_v57, %v931_v29 }
 0x232   : > { %v932_v32 = vld [vmem:[#allocation2 + $0x68] sm:$0xff] }
 0x233   : > { %915 = vst.msk [vmem:[#allocation2 + $0x78] sm:$0xff] %vm286_vm1, %v898_v30  ;;  %v970_v33 = vmax.f32 %v954_v31, 0.0  ;;  %v955_v34 = vadd.f32 %v1969_v57, %v932_v32 }
 0x235   : > { %1642 = vmatprep.mubr.msk.f32.mxu0 %vm286_vm1, %v970_v33  ;;  %v971_v35 = vmax.f32 %v955_v34, 0.0 }
 0x237   : > { %1643 = vmatmul.mubr.msk.f32.gmra.mrb[44].mxu0 %vm286_vm1, %v971_v35 }
 0x238   : > { %v933_v36 = vld [vmem:[#allocation2 + $0x70] sm:$0xff] }
 0x239   : > { %v956_v37 = vadd.f32 %v1969_v57, %v933_v36 }
 0x23a   : > { %v934_v38 = vld [vmem:[#allocation2 + $0x78] sm:$0xff] }
 0x23b   : > { %v972_v39 = vmax.f32 %v956_v37, 0.0  ;;  %v957_v40 = vadd.f32 %v1969_v57, %v934_v38 }
 0x23d   : > { %1645 = vmatprep.mubr.msk.f32.mxu0 %vm286_vm1, %v972_v39  ;;  %v973_v41 = vmax.f32 %v957_v40, 0.0 }
 0x23f   : > { %1646 = vmatmul.mubr.msk.f32.gmra.mrb[46].mxu0 %vm286_vm1, %v973_v41 }
 0x2da   : > { %v1626_v42 = vpop.f32.mrb[32].mxu0 }
 0x2db   : > { %v1434_v43 = vpack.c.bf16 %v1626_v42, %v1626_v42  ;;  %v1092_v57 = vpop.f32.mrb[33].mxu0 }
 0x2dc   : > { %v1433_v44 = vpack.c.bf16 %v1092_v57, %v1092_v57 }
 0x2dd   : > { %1237 = vst.msk [vmem:[%s2021_s17 + $0x4] sm:$0xf] %vm1235_vm2, %v1434_v43 }
 0x2de   : > { %1236 = vst.msk [vmem:[%s2021_s17] sm:$0xf] %vm1235_vm2, %v1433_v44 }
 0x2e2   : > { %v1629_v45 = vpop.f32.mrb[34].mxu0 }
 0x2e3   : > { %v1436_v46 = vpack.c.bf16 %v1629_v45, %v1629_v45  ;;  %v1102_v47 = vpop.f32.mrb[35].mxu0 }
 0x2e4   : > { %v1435_v48 = vpack.c.bf16 %v1102_v47, %v1102_v47 }
 0x2e5   : > { %1239 = vst.msk [vmem:[%s2021_s17 + $0xc] sm:$0xf] %vm1235_vm2, %v1436_v46 }
 0x2e6   : > { %1238 = vst.msk [vmem:[%s2021_s17 + $0x8] sm:$0xf] %vm1235_vm2, %v1435_v48 }
 0x2ea   : > { %v1632_v49 = vpop.f32.mrb[36].mxu0 }
 0x2eb   : > { %v1438_v50 = vpack.c.bf16 %v1632_v49, %v1632_v49  ;;  %v1112_v51 = vpop.f32.mrb[37].mxu0 }
 0x2ec   : > { %v1437_v52 = vpack.c.bf16 %v1112_v51, %v1112_v51 }
 0x2ed   : > { %1241 = vst.msk [vmem:[%s2021_s17 + $0x14] sm:$0xf] %vm1235_vm2, %v1438_v50 }
 0x2ee   : > { %1240 = vst.msk [vmem:[%s2021_s17 + $0x10] sm:$0xf] %vm1235_vm2, %v1437_v52 }
 0x2f2   : > { %v1635_v53 = vpop.f32.mrb[38].mxu0 }
 0x2f3   : > { %v1440_v54 = vpack.c.bf16 %v1635_v53, %v1635_v53  ;;  %v1122_v55 = vpop.f32.mrb[39].mxu0 }
 0x2f4   : > { %v1439_v56 = vpack.c.bf16 %v1122_v55, %v1122_v55 }
 0x2f5   : > { %1243 = vst.msk [vmem:[%s2021_s17 + $0x1c] sm:$0xf] %vm1235_vm2, %v1440_v54 }
 0x2f6   : > { %1242 = vst.msk [vmem:[%s2021_s17 + $0x18] sm:$0xf] %vm1235_vm2, %v1439_v56 }
 0x2fa   : > { %v1638_v58 = vpop.f32.mrb[40].mxu0 }
 0x2fb   : > { %v1442_v59 = vpack.c.bf16 %v1638_v58, %v1638_v58  ;;  %v1132_v60 = vpop.f32.mrb[41].mxu0 }
 0x2fc   : > { %v1441_v61 = vpack.c.bf16 %v1132_v60, %v1132_v60 }
 0x2fd   : > { %1245 = vst.msk [vmem:[%s2021_s17 + $0x24] sm:$0xf] %vm1235_vm2, %v1442_v59 }
 0x2fe   : > { %1244 = vst.msk [vmem:[%s2021_s17 + $0x20] sm:$0xf] %vm1235_vm2, %v1441_v61 }
 0x302   : > { %v1641_v62 = vpop.f32.mrb[42].mxu0 }
 0x303   : > { %v1444_v63 = vpack.c.bf16 %v1641_v62, %v1641_v62  ;;  %v1142_v0 = vpop.f32.mrb[43].mxu0 }
 0x304   : > { %v1443_v1 = vpack.c.bf16 %v1142_v0, %v1142_v0 }
 0x305   : > { %1247 = vst.msk [vmem:[%s2021_s17 + $0x2c] sm:$0xf] %vm1235_vm2, %v1444_v63 }
 0x306   : > { %1246 = vst.msk [vmem:[%s2021_s17 + $0x28] sm:$0xf] %vm1235_vm2, %v1443_v1 }
 0x30a   : > { %v1644_v2 = vpop.f32.mrb[44].mxu0 }
 0x30b   : > { %v1446_v3 = vpack.c.bf16 %v1644_v2, %v1644_v2  ;;  %v1152_v4 = vpop.f32.mrb[45].mxu0 }
 0x30c   : > { %v1445_v5 = vpack.c.bf16 %v1152_v4, %v1152_v4 }
 0x30d   : > { %1249 = vst.msk [vmem:[%s2021_s17 + $0x34] sm:$0xf] %vm1235_vm2, %v1446_v3 }
 0x30e   : > { %1248 = vst.msk [vmem:[%s2021_s17 + $0x30] sm:$0xf] %vm1235_vm2, %v1445_v5 }
 0x312   : > { %v1647_v6 = vpop.f32.mrb[46].mxu0 }
 0x313   : > { %v1448_v7 = vpack.c.bf16 %v1647_v6, %v1647_v6  ;;  %v1162_v8 = vpop.f32.mrb[47].mxu0 }
 0x314   : > { %v1447_v9 = vpack.c.bf16 %v1162_v8, %v1162_v8 }
 0x315   : > { %1251 = vst.msk [vmem:[%s2021_s17 + $0x3c] sm:$0xf] %vm1235_vm2, %v1448_v7 }
 0x316   : > { %1250 = vst.msk [vmem:[%s2021_s17 + $0x38] sm:$0xf] %vm1235_vm2, %v1447_v9 }
 0x317 PF: > { %s15_s20 = sadd.s32 1, %s1727_s20   ;;  %s2070_s18 = smov %s1723_s19 }
 0x318   : > { %p12_p5 = scmp.ge.s32.totalorder %s15_s20, 4   ;;  %s2071_s19 = smov %s2073_s21 }
 0x31a   :  { %14 = sbr.rel (!%p12_p5) target bundleno = 2 (0x2), region = 81 }

// kernel: emotional_graph_nn.3
= control target key start
LH: loop header
LB: loop body
LE: loop exit
PB: predicated region body
PF: predicated region fallthrough
CT: control target
= control target key end

     0   :  { %s1573_s18 = smov 0   ;;  %s1575_s19 = smov 0   ;;  %s1871_s0 = inlined_call_operand.vmem [shape: bf16[256,256], index: 0, kind: input, shape index: {}]   ;;  %s1872_s1 = inlined_call_operand.vmem [shape: bf16[256,16], index: 1, kind: input, shape index: {}]   ;;  %s1873_s2 = inlined_call_operand.vmem [shape: f32[1,16], index: 2, kind: input, shape index: {}]   ;;  %s1874_s3 = inlined_call_operand.vmem [shape: f32[16,128], index: 3, kind: input, shape index: {}]   ;;  %s1875_s4 = inlined_call_operand.vmem [shape: f32[1,128], index: 4, kind: input, shape index: {}]   ;;  %s1876_s5 = inlined_call_operand.vmem [shape: f32[256,128], index: 5, kind: output, shape index: {}]  }
   0x1   :  { %s1577_s20 = smov 0  }
   0x2 LB: > { %s27_s21 = sadd.s32 1, %s1536_s19  ;;  %p1200_p0 = scmp.ge.s32.totalorder %s1540_s20, 1  ;;  %s1540_s20 = sphi %s1577_s20, %s15_s20   ;;  %s1536_s19 = sphi %s1575_s19, %s1878_s19   ;;  %s1532_s18 = sphi %s1573_s18, %s1877_s18  }
   0x3   : > { %p29_p1 = scmp.ge.s32.totalorder %s27_s21, 2  ;;  %p219_p2 = scmp.lt.s32.totalorder %s1540_s20, 3 }
   0x5   : > { %s1880_s21 = smov (%p29_p1, %s27_s21), 0  ;;  %p220_p3 = pnand %p1200_p0, %p219_p2 }
   0x6   : > { %v1414_v0 = vld [vmem:[%s1872_s1 + $0x40] sm:$0xff] (!%p220_p3)   ;;  %s1201_s24 = sshll.u32 (!%p220_p3), %s1532_s18, 4  ;;  %v1416_v2 = vld [vmem:[%s1872_s1 + $0x48] sm:$0xff] (!%p220_p3)   ;;  %v1418_v4 = vld [vmem:[%s1872_s1 + $0x50] sm:$0xff] (!%p220_p3)   ;;  %vm286_vm0 = vcmask (!%p220_p3), 130048   ;;  %v1542_v32 = vmov (!%p220_p3), 0.0  }
   0x7   : > { %223 = sbr.rel (%p220_p3) target bundleno = 848 (0x350), region = 40  ;;  %v1415_v1 = vld [vmem:[%s1872_s1] sm:$0xff] (!%p220_p3)   ;;  %1259 = vmatprep.subr.bf16.mxu0 (!%p220_p3), %v1414_v0  ;;  %1373 = vmatprep.subr.bf16.mxu1 (!%p220_p3), %v1414_v0  ;;  %v1417_v3 = vld [vmem:[%s1872_s1 + $0x8] sm:$0xff] (!%p220_p3)   ;;  %p259_p4 = scmp.lt.s32.totalorder (!%p220_p3), %s1201_s24, 31  ;;  %v1419_v5 = vld [vmem:[%s1872_s1 + $0x10] sm:$0xff] (!%p220_p3)   ;;  %287 = vst.msk [vmem:[#allocation2] sm:$0xff] (!%p220_p3), %vm286_vm0, %v1542_v32 }
   0x8   : > { %1260 = vmatpush3.bf16.msra.mxu0 (!%p220_p3), %v1415_v1  ;;  %1381 = vmatpush3.bf16.msra.mxu1 (!%p220_p3), %v1415_v1  ;;  %v1420_v6 = vld [vmem:[%s1872_s1 + $0x58] sm:$0xff] (!%p220_p3)   ;;  %v1422_v8 = vld [vmem:[%s1872_s1 + $0x60] sm:$0xff] (!%p220_p3)   ;;  %v1424_v10 = vld [vmem:[%s1872_s1 + $0x68] sm:$0xff] (!%p220_p3)   ;;  %288 = vst.msk [vmem:[#allocation2 + $0x8] sm:$0xff] (!%p220_p3), %vm286_vm0, %v1542_v32 }
   0x9   : > { %1261 = vmatprep.subr.bf16.mxu0 (!%p220_p3), %v1416_v2  ;;  %1374 = vmatprep.subr.bf16.mxu1 (!%p220_p3), %v1416_v2  ;;  %v1421_v7 = vld [vmem:[%s1872_s1 + $0x18] sm:$0xff] (!%p220_p3)   ;;  %v1423_v9 = vld [vmem:[%s1872_s1 + $0x20] sm:$0xff] (!%p220_p3)   ;;  %v1425_v12 = vld [vmem:[%s1872_s1 + $0x28] sm:$0xff] (!%p220_p3)   ;;  %289 = vst.msk [vmem:[#allocation2 + $0x10] sm:$0xff] (!%p220_p3), %vm286_vm0, %v1542_v32 }
   0xa   : > { %v1426_v13 = vld [vmem:[%s1872_s1 + $0x70] sm:$0xff] (!%p220_p3)   ;;  %v1428_v16 = vld [vmem:[%s1872_s1 + $0x78] sm:$0xff] (!%p220_p3)   ;;  %290 = vst.msk [vmem:[#allocation2 + $0x18] sm:$0xff] (!%p220_p3), %vm286_vm0, %v1542_v32  ;;  %291 = vst.msk [vmem:[#allocation2 + $0x20] sm:$0xff] (!%p220_p3), %vm286_vm0, %v1542_v32 }
   0xb   : > { %v1427_v14 = vld [vmem:[%s1872_s1 + $0x30] sm:$0xff] (!%p220_p3)   ;;  %v1429_v17 = vld [vmem:[%s1872_s1 + $0x38] sm:$0xff] (!%p220_p3)   ;;  %292 = vst.msk [vmem:[#allocation2 + $0x28] sm:$0xff] (!%p220_p3), %vm286_vm0, %v1542_v32  ;;  %293 = vst.msk [vmem:[#allocation2 + $0x30] sm:$0xff] (!%p220_p3), %vm286_vm0, %v1542_v32 }
   0xc   : > { %1262 = vmatpush3.bf16.msra.mxu0 (!%p220_p3), %v1417_v3  ;;  %1382 = vmatpush3.bf16.msra.mxu1 (!%p220_p3), %v1417_v3  ;;  %294 = vst.msk [vmem:[#allocation2 + $0x38] sm:$0xff] (!%p220_p3), %vm286_vm0, %v1542_v32  ;;  %295 = vst.msk [vmem:[#allocation2 + $0x40] sm:$0xff] (!%p220_p3), %vm286_vm0, %v1542_v32  ;;  %v731_v33 = vld [vmem:[%s1874_s3] sm:$0xff] (!%p220_p3)  ;;  %v732_v34 = vld [vmem:[%s1874_s3 + $0x8] sm:$0xff] (!%p220_p3) }
   0xd   : > { %1263 = vmatprep.subr.bf16.mxu0 (!%p220_p3), %v1418_v4  ;;  %1375 = vmatprep.subr.bf16.mxu1 (!%p220_p3), %v1418_v4  ;;  %296 = vst.msk [vmem:[#allocation2 + $0x48] sm:$0xff] (!%p220_p3), %vm286_vm0, %v1542_v32  ;;  %297 = vst.msk [vmem:[#allocation2 + $0x50] sm:$0xff] (!%p220_p3), %vm286_vm0, %v1542_v32  ;;  %v1369_v35 = vpack.c.bf16 (!%p220_p3), %v732_v34, %v731_v33  ;;  %v1694_v2 = vld [vmem:[%s1873_s2] ss:$0 sm:$0xff] (!%p220_p3) }
   0xe   : > { %s1882_s24 = smov (!%p259_p4, %s1201_s24), 31  ;;  %298 = vst.msk [vmem:[#allocation2 + $0x58] sm:$0xff] %vm286_vm0, %v1542_v32  ;;  %299 = vst.msk [vmem:[#allocation2 + $0x60] sm:$0xff] %vm286_vm0, %v1542_v32  ;;  %v303_v37 = vld [vmem:[#allocation2] sm:$0xff] }
   0xf   : > { %s1258_s14 = sshll.u32 %s1882_s24, 3  ;;  %300 = vst.msk [vmem:[#allocation2 + $0x68] sm:$0xff] %vm286_vm0, %v1542_v32  ;;  %301 = vst.msk [vmem:[#allocation2 + $0x70] sm:$0xff] %vm286_vm0, %v1542_v32  ;;  %v304_v44 = vld [vmem:[#allocation2 + $0x8] sm:$0xff] }
  0x10   : > { %1264 = vmatpush3.bf16.msra.mxu0 %v1419_v5  ;;  %1383 = vmatpush3.bf16.msra.mxu1 %v1419_v5  ;;  %s1626_s22 = scalar_lea.vmem %s1871_s0, %s1258_s14  ;;  %302 = vst.msk [vmem:[#allocation2 + $0x78] sm:$0xff] %vm286_vm0, %v1542_v32  ;;  %v305_v57 = vld [vmem:[#allocation2 + $0x10] sm:$0xff]  ;;  %s1828_s28 = scalar_lea.vmem %s1876_s5, %s1258_s14 }
  0x11   : > { %1265 = vmatprep.subr.bf16.mxu0 %v1420_v6  ;;  %1376 = vmatprep.subr.bf16.mxu1 %v1420_v6  ;;  %v1432_v11 = vld [vmem:[%s1626_s22 + $0x4] ss:$8 sps:$4 sm:$0xff]   ;;  %v1430_v18 = vld [vmem:[%s1626_s22] ss:$8 sps:$4 sm:$0xff]   ;;  %v1433_v19 = vld [vmem:[%s1626_s22 + $0x14] ss:$8 sps:$4 sm:$0xff]  }
  0x12   : > { %575 = vmatprep.mubr.bf16.mxu0 %v1432_v11  ;;  %v1447_v15 = vld [vmem:[%s1626_s22 + $0x64] ss:$8 sps:$4 sm:$0xff]   ;;  %v1445_v20 = vld [vmem:[%s1626_s22 + $0x60] ss:$8 sps:$4 sm:$0xff]   ;;  %v1451_v21 = vld [vmem:[%s1626_s22 + $0x74] ss:$8 sps:$4 sm:$0xff]  }
  0x13   : > { %623 = vmatprep.mubr.bf16.mxu1 %v1447_v15  ;;  %v1435_v22 = vld [vmem:[%s1626_s22 + $0x10] ss:$8 sps:$4 sm:$0xff]   ;;  %v1436_v23 = vld [vmem:[%s1626_s22 + $0x24] ss:$8 sps:$4 sm:$0xff]   ;;  %v1438_v25 = vld [vmem:[%s1626_s22 + $0x20] ss:$8 sps:$4 sm:$0xff]  }
  0x14   : > { %1266 = vmatpush3.bf16.msra.mxu0 %v1421_v7  ;;  %1384 = vmatpush3.bf16.msra.mxu1 %v1421_v7  ;;  %v1453_v24 = vld [vmem:[%s1626_s22 + $0x70] ss:$8 sps:$4 sm:$0xff]   ;;  %v1439_v26 = vld [vmem:[%s1626_s22 + $0x34] ss:$8 sps:$4 sm:$0xff]   ;;  %v1442_v28 = vld [vmem:[%s1626_s22 + $0x44] ss:$8 sps:$4 sm:$0xff]  }
  0x15   : > { %1267 = vmatprep.subr.bf16.mxu0 %v1422_v8  ;;  %1377 = vmatprep.subr.bf16.mxu1 %v1422_v8  ;;  %v1441_v27 = vld [vmem:[%s1626_s22 + $0x30] ss:$8 sps:$4 sm:$0xff]   ;;  %v1444_v29 = vld [vmem:[%s1626_s22 + $0x40] ss:$8 sps:$4 sm:$0xff]   ;;  %v1448_v30 = vld [vmem:[%s1626_s22 + $0x54] ss:$8 sps:$4 sm:$0xff]  }
  0x16   : > { %v1450_v31 = vld [vmem:[%s1626_s22 + $0x50] ss:$8 sps:$4 sm:$0xff]   ;;  %v315_v42 = vld [vmem:[#allocation2 + $0x60] sm:$0xff]  ;;  %v316_v50 = vld [vmem:[#allocation2 + $0x68] sm:$0xff] }
  0x17   : > { %v317_v62 = vld [vmem:[#allocation2 + $0x70] sm:$0xff]  ;;  %v306_v0 = vld [vmem:[#allocation2 + $0x18] sm:$0xff] }
  0x18   : > { %1268 = vmatpush3.bf16.msra.mxu0 %v1423_v9  ;;  %1385 = vmatpush3.bf16.msra.mxu1 %v1423_v9  ;;  %v318_v7 = vld [vmem:[#allocation2 + $0x78] sm:$0xff] }
  0x19   : > { %1269 = vmatprep.subr.bf16.mxu0 %v1424_v10  ;;  %1378 = vmatprep.subr.bf16.mxu1 %v1424_v10 }
  0x1c   : > { %1270 = vmatpush3.bf16.msra.mxu0 %v1425_v12  ;;  %1386 = vmatpush3.bf16.msra.mxu1 %v1425_v12 }
  0x1d   : > { %1271 = vmatprep.subr.bf16.mxu0 %v1426_v13  ;;  %1379 = vmatprep.subr.bf16.mxu1 %v1426_v13 }
  0x20   : > { %1272 = vmatpush3.bf16.msra.mxu0 %v1427_v14  ;;  %1387 = vmatpush3.bf16.msra.mxu1 %v1427_v14 }
  0x21   : > { %1273 = vmatprep.subr.bf16.mxu0 %v1428_v16  ;;  %1380 = vmatprep.subr.bf16.mxu1 %v1428_v16 }
  0x24   : > { %1274 = vmatpush3.bf16.msra.mxu0 %v1429_v17  ;;  %1388 = vmatpush3.bf16.msra.mxu1 %v1429_v17 }
  0x25   : > { %1370 = vmatprep.subr.bf16.mxu1 %v1369_v35 }
  0x27   : > { %576 = vmatmul.mubr.bf16.vlgmr.msra.gmra.mrb[0].mxu0 %v1430_v18  ;;  %624 = vmatmul.mubr.bf16.vlgmr.msra.gmra.mrb[0].mxu1 %v1445_v20 }
  0x28   : > { %583 = vmatprep.mubr.bf16.mxu0 %v1433_v19  ;;  %631 = vmatprep.mubr.bf16.mxu1 %v1451_v21  ;;  %v307_v19 = vld [vmem:[#allocation2 + $0x20] sm:$0xff] }
  0x29   : > { %1372 = vmatpush3.bf16.msra.mxu1 %v1369_v35  ;;  %v309_v35 = vld [vmem:[#allocation2 + $0x30] sm:$0xff] }
  0x2f   : > { %584 = vmatmul.mubr.bf16.gmra.mrb[4].mxu0 %v1435_v22  ;;  %632 = vmatmul.mubr.bf16.gmra.mrb[4].mxu1 %v1453_v24  ;;  %v308_v24 = vld [vmem:[#allocation2 + $0x28] sm:$0xff] }
  0x30   : > { %591 = vmatprep.mubr.bf16.mxu0 %v1436_v23 }
  0x37   : > { %592 = vmatmul.mubr.bf16.gmra.mrb[8].mxu0 %v1438_v25 }
  0x38   : > { %599 = vmatprep.mubr.bf16.mxu0 %v1439_v26 }
  0x3f   : > { %600 = vmatmul.mubr.bf16.gmra.mrb[12].mxu0 %v1441_v27 }
  0x40   : > { %607 = vmatprep.mubr.bf16.mxu0 %v1442_v28 }
  0x47   : > { %608 = vmatmul.mubr.bf16.gmra.mrb[16].mxu0 %v1444_v29 }
  0x48   : > { %615 = vmatprep.mubr.bf16.mxu0 %v1448_v30 }
  0x4f   : > { %616 = vmatmul.mubr.bf16.gmra.mrb[20].mxu0 %v1450_v31 }
  0xfa   : > { %v1275_v36 = vpop.f32.mrb[0].mxu0  ;;  %v1311_v39 = vpop.f32.mrb[0].mxu1 }
  0xfb   : > { %v1276_v38 = vpop.f32.mrb[1].mxu0  ;;  %v1312_v43 = vpop.f32.mrb[1].mxu1 }
  0xfc   : > { %v1277_v40 = vadd.f32 %v1276_v38, %v1275_v36  ;;  %v1278_v41 = vpop.f32.mrb[2].mxu0  ;;  %v1313_v46 = vadd.f32 %v1312_v43, %v1311_v39  ;;  %v1314_v47 = vpop.f32.mrb[2].mxu1 }
  0xfd   : > { %v1279_v45 = vpop.f32.mrb[3].mxu0  ;;  %v1315_v51 = vpop.f32.mrb[3].mxu1 }
  0xfe   : > { %v640_v48 = vadd.f32 %v1277_v40, %v303_v37  ;;  %v1280_v49 = vadd.f32 %v1279_v45, %v1278_v41  ;;  %v652_v52 = vadd.f32 %v1313_v46, %v315_v42  ;;  %v1316_v53 = vadd.f32 %v1315_v51, %v1314_v47  ;;  %v310_v40 = vld [vmem:[#allocation2 + $0x38] sm:$0xff]  ;;  %v311_v51 = vld [vmem:[#allocation2 + $0x40] sm:$0xff] }
 0x100   : > { %657 = vst.msk [vmem:[#allocation2] sm:$0xff] %vm286_vm0, %v640_v48  ;;  %v641_v54 = vadd.f32 %v1280_v49, %v304_v44  ;;  %669 = vst.msk [vmem:[#allocation2 + $0x60] sm:$0xff] %vm286_vm0, %v652_v52  ;;  %v653_v55 = vadd.f32 %v1316_v53, %v316_v50 }
 0x102   : > { %658 = vst.msk [vmem:[#allocation2 + $0x8] sm:$0xff] %vm286_vm0, %v641_v54  ;;  %v1281_v56 = vpop.f32.mrb[4].mxu0  ;;  %670 = vst.msk [vmem:[#allocation2 + $0x68] sm:$0xff] %vm286_vm0, %v653_v55  ;;  %v1317_v59 = vpop.f32.mrb[4].mxu1 }
 0x103   : > { %v1282_v58 = vpop.f32.mrb[5].mxu0  ;;  %v1318_v63 = vpop.f32.mrb[5].mxu1 }
 0x104   : > { %v1283_v60 = vadd.f32 %v1282_v58, %v1281_v56  ;;  %v1284_v61 = vpop.f32.mrb[6].mxu0  ;;  %v1319_v3 = vadd.f32 %v1318_v63, %v1317_v59  ;;  %v1320_v4 = vpop.f32.mrb[6].mxu1  ;;  %v312_v56 = vld [vmem:[#allocation2 + $0x48] sm:$0xff] }
 0x105   : > { %v1285_v1 = vpop.f32.mrb[7].mxu0  ;;  %v1321_v8 = vpop.f32.mrb[7].mxu1 }
 0x106   : > { %v642_v5 = vadd.f32 %v1283_v60, %v305_v57  ;;  %v1286_v6 = vadd.f32 %v1285_v1, %v1284_v61  ;;  %v654_v10 = vadd.f32 %v1319_v3, %v317_v62  ;;  %v1322_v11 = vadd.f32 %v1321_v8, %v1320_v4  ;;  %v313_v4 = vld [vmem:[#allocation2 + $0x50] sm:$0xff] }
 0x107   : > { %v676_v9 = vld [vmem:[#allocation2] sm:$0xff] }
 0x108   : > { %659 = vst.msk [vmem:[#allocation2 + $0x10] sm:$0xff] %vm286_vm0, %v642_v5  ;;  %v643_v12 = vadd.f32 %v1286_v6, %v306_v0  ;;  %v699_v13 = vadd.f32 %v1694_v2, %v676_v9  ;;  %671 = vst.msk [vmem:[#allocation2 + $0x70] sm:$0xff] %vm286_vm0, %v654_v10  ;;  %v655_v15 = vadd.f32 %v1322_v11, %v318_v7  ;;  %v314_v9 = vld [vmem:[#allocation2 + $0x58] sm:$0xff] }
 0x109   : > { %v677_v14 = vld [vmem:[#allocation2 + $0x8] sm:$0xff] }
 0x10a   : > { %660 = vst.msk [vmem:[#allocation2 + $0x18] sm:$0xff] %vm286_vm0, %v643_v12  ;;  %v1287_v16 = vpop.f32.mrb[8].mxu0  ;;  %v715_v17 = vmax.f32 %v699_v13, 0.0  ;;  %v700_v18 = vadd.f32 %v1694_v2, %v677_v14  ;;  %672 = vst.msk [vmem:[#allocation2 + $0x78] sm:$0xff] %vm286_vm0, %v655_v15 }
 0x10b   : > { %v1288_v20 = vpop.f32.mrb[9].mxu0 }
 0x10c   : > { %v1289_v21 = vadd.f32 %v1288_v20, %v1287_v16  ;;  %v1290_v22 = vpop.f32.mrb[10].mxu0  ;;  %1345 = vmatprep.mubr.msk.f32.mxu1 %vm286_vm0, %v715_v17  ;;  %v716_v23 = vmax.f32 %v700_v18, 0.0  ;;  %v688_v20 = vld [vmem:[#allocation2 + $0x60] sm:$0xff] }
 0x10d   : > { %v1291_v25 = vpop.f32.mrb[11].mxu0 }
 0x10e   : > { %v644_v26 = vadd.f32 %v1289_v21, %v307_v19  ;;  %v1292_v27 = vadd.f32 %v1291_v25, %v1290_v22  ;;  %1346 = vmatmul.mubr.msk.f32.vlgmr.msra.gmra.mrb[8].mxu1 %vm286_vm0, %v716_v23  ;;  %v711_v25 = vadd.f32 %v1694_v2, %v688_v20 }
 0x10f   : > { %v678_v28 = vld [vmem:[#allocation2 + $0x10] sm:$0xff] }
 0x110   : > { %661 = vst.msk [vmem:[#allocation2 + $0x20] sm:$0xff] %vm286_vm0, %v644_v26  ;;  %v645_v29 = vadd.f32 %v1292_v27, %v308_v24  ;;  %v701_v30 = vadd.f32 %v1694_v2, %v678_v28  ;;  %v690_v23 = vld [vmem:[#allocation2 + $0x70] sm:$0xff]  ;;  %v689_v26 = vld [vmem:[#allocation2 + $0x68] sm:$0xff] }
 0x111   : > { %v679_v31 = vld [vmem:[#allocation2 + $0x18] sm:$0xff] }
 0x112   : > { %662 = vst.msk [vmem:[#allocation2 + $0x28] sm:$0xff] %vm286_vm0, %v645_v29  ;;  %v1293_v32 = vpop.f32.mrb[12].mxu0  ;;  %v717_v33 = vmax.f32 %v701_v30, 0.0  ;;  %v702_v34 = vadd.f32 %v1694_v2, %v679_v31  ;;  %v713_v29 = vadd.f32 %v1694_v2, %v690_v23  ;;  %v712_v31 = vadd.f32 %v1694_v2, %v689_v26 }
 0x113   : > { %v1294_v36 = vpop.f32.mrb[13].mxu0 }
 0x114   : > { %v1295_v37 = vadd.f32 %v1294_v36, %v1293_v32  ;;  %v1296_v38 = vpop.f32.mrb[14].mxu0  ;;  %1348 = vmatprep.mubr.msk.f32.mxu1 %vm286_vm0, %v717_v33  ;;  %v718_v39 = vmax.f32 %v702_v34, 0.0  ;;  %v727_v32 = vmax.f32 %v711_v25, 0.0  ;;  %v691_v33 = vld [vmem:[#allocation2 + $0x78] sm:$0xff]  ;;  %v729_v34 = vmax.f32 %v713_v29, 0.0 }
 0x115   : > { %v1297_v41 = vpop.f32.mrb[15].mxu0  ;;  %v714_v36 = vadd.f32 %v1694_v2, %v691_v33 }
 0x116   : > { %v646_v42 = vadd.f32 %v1295_v37, %v309_v35  ;;  %v1298_v43 = vadd.f32 %v1297_v41, %v1296_v38  ;;  %1349 = vmatmul.mubr.msk.f32.gmra.mrb[10].mxu1 %vm286_vm0, %v718_v39  ;;  %v728_v35 = vmax.f32 %v712_v31, 0.0  ;;  %v1239_v38 = vld [vmem:[%s1875_s4] ss:$0 sm:$0xff] }
 0x117   : > { %v680_v44 = vld [vmem:[#allocation2 + $0x20] sm:$0xff]  ;;  %v730_v37 = vmax.f32 %v714_v36, 0.0 }
 0x118   : > { %663 = vst.msk [vmem:[#allocation2 + $0x30] sm:$0xff] %vm286_vm0, %v646_v42  ;;  %v647_v45 = vadd.f32 %v1298_v43, %v310_v40  ;;  %v703_v46 = vadd.f32 %v1694_v2, %v680_v44 }
 0x119   : > { %v681_v47 = vld [vmem:[#allocation2 + $0x28] sm:$0xff] }
 0x11a   : > { %664 = vst.msk [vmem:[#allocation2 + $0x38] sm:$0xff] %vm286_vm0, %v647_v45  ;;  %v1299_v48 = vpop.f32.mrb[16].mxu0  ;;  %v719_v49 = vmax.f32 %v703_v46, 0.0  ;;  %v704_v50 = vadd.f32 %v1694_v2, %v681_v47 }
 0x11b   : > { %v1300_v52 = vpop.f32.mrb[17].mxu0 }
 0x11c   : > { %v1301_v53 = vadd.f32 %v1300_v52, %v1299_v48  ;;  %v1302_v54 = vpop.f32.mrb[18].mxu0  ;;  %1351 = vmatprep.mubr.msk.f32.mxu1 %vm286_vm0, %v719_v49  ;;  %v720_v55 = vmax.f32 %v704_v50, 0.0 }
 0x11d   : > { %v1303_v57 = vpop.f32.mrb[19].mxu0 }
 0x11e   : > { %v648_v58 = vadd.f32 %v1301_v53, %v311_v51  ;;  %v1304_v59 = vadd.f32 %v1303_v57, %v1302_v54  ;;  %1352 = vmatmul.mubr.msk.f32.gmra.mrb[12].mxu1 %vm286_vm0, %v720_v55 }
 0x11f   : > { %v682_v60 = vld [vmem:[#allocation2 + $0x30] sm:$0xff] }
 0x120   : > { %665 = vst.msk [vmem:[#allocation2 + $0x40] sm:$0xff] %vm286_vm0, %v648_v58  ;;  %v649_v61 = vadd.f32 %v1304_v59, %v312_v56  ;;  %v705_v62 = vadd.f32 %v1694_v2, %v682_v60 }
 0x121   : > { %v683_v63 = vld [vmem:[#allocation2 + $0x38] sm:$0xff] }
 0x122   : > { %666 = vst.msk [vmem:[#allocation2 + $0x48] sm:$0xff] %vm286_vm0, %v649_v61  ;;  %v1305_v0 = vpop.f32.mrb[20].mxu0  ;;  %v721_v1 = vmax.f32 %v705_v62, 0.0  ;;  %v706_v3 = vadd.f32 %v1694_v2, %v683_v63 }
 0x123   : > { %v1306_v5 = vpop.f32.mrb[21].mxu0 }
 0x124   : > { %v1307_v6 = vadd.f32 %v1306_v5, %v1305_v0  ;;  %v1308_v7 = vpop.f32.mrb[22].mxu0  ;;  %1354 = vmatprep.mubr.msk.f32.mxu1 %vm286_vm0, %v721_v1  ;;  %v722_v8 = vmax.f32 %v706_v3, 0.0 }
 0x125   : > { %v1309_v10 = vpop.f32.mrb[23].mxu0 }
 0x126   : > { %v650_v11 = vadd.f32 %v1307_v6, %v313_v4  ;;  %v1310_v12 = vadd.f32 %v1309_v10, %v1308_v7  ;;  %1355 = vmatmul.mubr.msk.f32.gmra.mrb[14].mxu1 %vm286_vm0, %v722_v8 }
 0x127   : > { %v684_v13 = vld [vmem:[#allocation2 + $0x40] sm:$0xff] }
 0x128   : > { %667 = vst.msk [vmem:[#allocation2 + $0x50] sm:$0xff] %vm286_vm0, %v650_v11  ;;  %v651_v14 = vadd.f32 %v1310_v12, %v314_v9  ;;  %v707_v15 = vadd.f32 %v1694_v2, %v684_v13 }
 0x129   : > { %v685_v16 = vld [vmem:[#allocation2 + $0x48] sm:$0xff] }
 0x12a   : > { %668 = vst.msk [vmem:[#allocation2 + $0x58] sm:$0xff] %vm286_vm0, %v651_v14  ;;  %v723_v17 = vmax.f32 %v707_v15, 0.0  ;;  %v708_v18 = vadd.f32 %v1694_v2, %v685_v16 }
 0x12c   : > { %1357 = vmatprep.mubr.msk.f32.mxu1 %vm286_vm0, %v723_v17  ;;  %v724_v19 = vmax.f32 %v708_v18, 0.0 }
 0x12e   : > { %1358 = vmatmul.mubr.msk.f32.gmra.mrb[16].mxu1 %vm286_vm0, %v724_v19 }
 0x12f   : > { %v686_v21 = vld [vmem:[#allocation2 + $0x50] sm:$0xff] }
 0x130   : > { %v709_v22 = vadd.f32 %v1694_v2, %v686_v21 }
 0x131   : > { %v687_v24 = vld [vmem:[#allocation2 + $0x58] sm:$0xff] }
 0x132   : > { %v725_v27 = vmax.f32 %v709_v22, 0.0  ;;  %v710_v28 = vadd.f32 %v1694_v2, %v687_v24 }
 0x134   : > { %1360 = vmatprep.mubr.msk.f32.mxu1 %vm286_vm0, %v725_v27  ;;  %v726_v30 = vmax.f32 %v710_v28, 0.0 }
 0x136   : > { %1361 = vmatmul.mubr.msk.f32.gmra.mrb[18].mxu1 %vm286_vm0, %v726_v30 }
 0x137   : > { %1363 = vmatprep.mubr.msk.f32.mxu1 %vm286_vm0, %v727_v32 }
 0x13a   : > { %1364 = vmatmul.mubr.msk.f32.gmra.mrb[20].mxu1 %vm286_vm0, %v728_v35 }
 0x13b   : > { %1366 = vmatprep.mubr.msk.f32.mxu1 %vm286_vm0, %v729_v34 }
 0x13e   : > { %1367 = vmatmul.mubr.msk.f32.gmra.mrb[22].mxu1 %vm286_vm0, %v730_v37 }
 0x1e1   : > { %v1347_v39 = vpop.f32.mrb[8].mxu1 }
 0x1e2   : > { %v860_v40 = vadd.f32 %v1347_v39, %v1239_v38  ;;  %v854_v41 = vpop.f32.mrb[9].mxu1 }
 0x1e3   : > { %v855_v42 = vadd.f32 %v1239_v38, %v854_v41 }
 0x1e4   : > { %935 = vmax.xlane.f32.xlu0 %v860_v40 }
 0x1e8   : > { %933 = vmax.xlane.f32.xlu0 %v855_v42 }
 0x1e9   : > { %v1350_v43 = vpop.f32.mrb[10].mxu1 }
 0x1ea   : > { %v870_v44 = vadd.f32 %v1350_v43, %v1239_v38  ;;  %v864_v2 = vpop.f32.mrb[11].mxu1 }
 0x1eb   : > { %v865_v45 = vadd.f32 %v1239_v38, %v864_v2 }
 0x1ec   : > { %939 = vmax.xlane.f32.xlu1 %v870_v44 }
 0x1f0   : > { %937 = vmax.xlane.f32.xlu1 %v865_v45 }
 0x1f1   : > { %v1353_v46 = vpop.f32.mrb[12].mxu1 }
 0x1f2   : > { %v880_v47 = vadd.f32 %v1353_v46, %v1239_v38  ;;  %v874_v48 = vpop.f32.mrb[13].mxu1 }
 0x1f3   : > { %v875_v49 = vadd.f32 %v1239_v38, %v874_v48 }
 0x1f4   : > { %943 = vmax.xlane.f32.xlu1 %v880_v47 }
 0x1f5   : > { %941 = vmax.xlane.f32.xlu0 %v875_v49 }
 0x1f9   : > { %v1356_v50 = vpop.f32.mrb[14].mxu1 }
 0x1fa   : > { %v890_v51 = vadd.f32 %v1356_v50, %v1239_v38  ;;  %v884_v52 = vpop.f32.mrb[15].mxu1 }
 0x1fb   : > { %v885_v53 = vadd.f32 %v1239_v38, %v884_v52 }
 0x1fc   : > { %947 = vmax.xlane.f32.xlu1 %v890_v51 }
 0x1fd   : > { %945 = vmax.xlane.f32.xlu0 %v885_v53 }
 0x201   : > { %v1359_v54 = vpop.f32.mrb[16].mxu1 }
 0x202   : > { %v1743_v55 = vadd.f32 %v1359_v54, %v1239_v38  ;;  %v894_v56 = vpop.f32.mrb[17].mxu1 }
 0x203   : > { %v1745_v57 = vadd.f32 %v1239_v38, %v894_v56 }
 0x204   : > { %951 = vmax.xlane.f32.xlu1 %v1743_v55 }
 0x205   : > { %949 = vmax.xlane.f32.xlu0 %v1745_v57 }
 0x209   : > { %v1362_v58 = vpop.f32.mrb[18].mxu1 }
 0x20a   : > { %v1749_v59 = vadd.f32 %v1362_v58, %v1239_v38  ;;  %v904_v60 = vpop.f32.mrb[19].mxu1 }
 0x20b   : > { %v1751_v61 = vadd.f32 %v1239_v38, %v904_v60 }
 0x20c   : > { %955 = vmax.xlane.f32.xlu1 %v1749_v59 }
 0x20d   : > { %v1365_v62 = vpop.f32.mrb[20].mxu1  ;;  %953 = vmax.xlane.f32.xlu0 %v1751_v61 }
 0x20e   : > { %v1755_v63 = vadd.f32 %v1365_v62, %v1239_v38  ;;  %v914_v0 = vpop.f32.mrb[21].mxu1 }
 0x20f   : > { %v1757_v1 = vadd.f32 %v1239_v38, %v914_v0 }
 0x210   : > { %959 = vmax.xlane.f32.xlu1 %v1755_v63 }
 0x211   : > { %v1368_v3 = vpop.f32.mrb[22].mxu1  ;;  %957 = vmax.xlane.f32.xlu0 %v1757_v1 }
 0x212   : > { %v1761_v4 = vadd.f32 %v1368_v3, %v1239_v38  ;;  %v924_v5 = vpop.f32.mrb[23].mxu1 }
 0x213   : > { %v1763_v6 = vadd.f32 %v1239_v38, %v924_v5 }
 0x214   : > { %963 = vmax.xlane.f32.xlu1 %v1761_v4 }
 0x215   : > { %961 = vmax.xlane.f32.xlu0 %v1763_v6 }
 0x271   : > { %v936_v7 = vpop.xlane.xlu0 %935 }
 0x272   : > { %v1767_v8 = vsub.f32 %v860_v40, %v936_v7 }
 0x274   : > { %v983_v9 = vmul.f32 1.442695, %v1767_v8 }
 0x275   : > { %v934_v10 = vpop.xlane.xlu0 %933 }
 0x276   : > { %1454 = vpow2.f32 %v983_v9  ;;  %v1770_v11 = vsub.f32 %v855_v42, %v934_v10 }
 0x278   : > { %v981_v12 = vmul.f32 1.442695, %v1770_v11 }
 0x279   : > { %v940_v13 = vpop.xlane.xlu1 %939 }
 0x27a   : > { %1456 = vpow2.f32 %v981_v12  ;;  %v1773_v14 = vsub.f32 %v870_v44, %v940_v13 }
 0x27c   : > { %v987_v15 = vmul.f32 1.442695, %v1773_v14 }
 0x27d   : > { %v938_v16 = vpop.xlane.xlu1 %937 }
 0x27e   : > { %1458 = vpow2.f32 %v987_v15  ;;  %v1776_v17 = vsub.f32 %v865_v45, %v938_v16 }
 0x280   : > { %v1455_v18 = vpop.eup %1454  ;;  %v985_v19 = vmul.f32 1.442695, %v1776_v17 }
 0x281   : > { %1015 = vadd.xlane.f32.xlu1 %v1455_v18  ;;  %v944_v20 = vpop.xlane.xlu1 %943 }
 0x282   : > { %1460 = vpow2.f32 %v985_v19  ;;  %v1779_v21 = vsub.f32 %v880_v47, %v944_v20  ;;  %v942_v22 = vpop.xlane.xlu0 %941 }
 0x283   : > { %v1781_v23 = vsub.f32 %v875_v49, %v942_v22 }
 0x284   : > { %v1457_v24 = vpop.eup %1456  ;;  %v991_v25 = vmul.f32 1.442695, %v1779_v21 }
 0x285   : > { %v989_v26 = vmul.f32 1.442695, %v1781_v23  ;;  %1013 = vadd.xlane.f32.xlu0 %v1457_v24 }
 0x286   : > { %1462 = vpow2.f32 %v991_v25 }
 0x287   : > { %1464 = vpow2.f32 %v989_v26 }
 0x288   : > { %v1459_v27 = vpop.eup %1458 }
 0x289   : > { %1019 = vadd.xlane.f32.xlu1 %v1459_v27  ;;  %v948_v28 = vpop.xlane.xlu1 %947 }
 0x28a   : > { %v1785_v29 = vsub.f32 %v890_v51, %v948_v28  ;;  %v946_v30 = vpop.xlane.xlu0 %945 }
 0x28b   : > { %v1787_v31 = vsub.f32 %v885_v53, %v946_v30 }
 0x28c   : > { %v1461_v32 = vpop.eup %1460  ;;  %v995_v33 = vmul.f32 1.442695, %v1785_v29 }
 0x28d   : > { %v993_v34 = vmul.f32 1.442695, %v1787_v31  ;;  %1017 = vadd.xlane.f32.xlu0 %v1461_v32 }
 0x28e   : > { %1466 = vpow2.f32 %v995_v33 }
 0x28f   : > { %1468 = vpow2.f32 %v993_v34 }
 0x290   : > { %v1463_v35 = vpop.eup %1462 }
 0x291   : > { %v1465_v36 = vpop.eup %1464  ;;  %1023 = vadd.xlane.f32.xlu1 %v1463_v35  ;;  %v952_v37 = vpop.xlane.xlu1 %951 }
 0x292   : > { %v1792_v38 = vsub.f32 %v1743_v55, %v952_v37  ;;  %1021 = vadd.xlane.f32.xlu0 %v1465_v36  ;;  %v950_v39 = vpop.xlane.xlu0 %949 }
 0x293   : > { %v1795_v40 = vsub.f32 %v1745_v57, %v950_v39 }
 0x294   : > { %v999_v41 = vmul.f32 1.442695, %v1792_v38 }
 0x295   : > { %v997_v42 = vmul.f32 1.442695, %v1795_v40 }
 0x296   : > { %1470 = vpow2.f32 %v999_v41 }
 0x297   : > { %1472 = vpow2.f32 %v997_v42 }
 0x298   : > { %v1467_v43 = vpop.eup %1466 }
 0x299   : > { %v1469_v44 = vpop.eup %1468  ;;  %1027 = vadd.xlane.f32.xlu1 %v1467_v43  ;;  %v956_v2 = vpop.xlane.xlu1 %955 }
 0x29a   : > { %v1800_v45 = vsub.f32 %v1749_v59, %v956_v2  ;;  %1025 = vadd.xlane.f32.xlu0 %v1469_v44  ;;  %v954_v46 = vpop.xlane.xlu0 %953 }
 0x29b   : > { %v1803_v47 = vsub.f32 %v1751_v61, %v954_v46 }
 0x29c   : > { %v1003_v48 = vmul.f32 1.442695, %v1800_v45 }
 0x29d   : > { %v1001_v49 = vmul.f32 1.442695, %v1803_v47  ;;  %v960_v50 = vpop.xlane.xlu1 %959 }
 0x29e   : > { %1474 = vpow2.f32 %v1003_v48  ;;  %v1808_v51 = vsub.f32 %v1755_v63, %v960_v50  ;;  %v958_v52 = vpop.xlane.xlu0 %957 }
 0x29f   : > { %1476 = vpow2.f32 %v1001_v49  ;;  %v1811_v53 = vsub.f32 %v1757_v1, %v958_v52 }
 0x2a0   : > { %v1471_v54 = vpop.eup %1470  ;;  %v1007_v55 = vmul.f32 1.442695, %v1808_v51 }
 0x2a1   : > { %v1473_v56 = vpop.eup %1472  ;;  %v1005_v57 = vmul.f32 1.442695, %v1811_v53  ;;  %1031 = vadd.xlane.f32.xlu1 %v1471_v54  ;;  %v964_v58 = vpop.xlane.xlu1 %963 }
 0x2a2   : > { %1478 = vpow2.f32 %v1007_v55  ;;  %v1816_v59 = vsub.f32 %v1761_v4, %v964_v58  ;;  %1029 = vadd.xlane.f32.xlu0 %v1473_v56  ;;  %v962_v60 = vpop.xlane.xlu0 %961 }
 0x2a3   : > { %1480 = vpow2.f32 %v1005_v57  ;;  %v1819_v61 = vsub.f32 %v1763_v6, %v962_v60 }
 0x2a4   : > { %v1011_v62 = vmul.f32 1.442695, %v1816_v59 }
 0x2a5   : > { %v1009_v63 = vmul.f32 1.442695, %v1819_v61 }
 0x2a6   : > { %1482 = vpow2.f32 %v1011_v62 }
 0x2a7   : > { %1484 = vpow2.f32 %v1009_v63 }
 0x2a8   : > { %v1475_v0 = vpop.eup %1474 }
 0x2a9   : > { %v1477_v1 = vpop.eup %1476  ;;  %1035 = vadd.xlane.f32.xlu1 %v1475_v0 }
 0x2aa   : > { %1033 = vadd.xlane.f32.xlu0 %v1477_v1 }
 0x2ac   : > { %v1479_v3 = vpop.eup %1478 }
 0x2ad   : > { %v1481_v5 = vpop.eup %1480  ;;  %1039 = vadd.xlane.f32.xlu1 %v1479_v3 }
 0x2ae   : > { %1037 = vadd.xlane.f32.xlu0 %v1481_v5 }
 0x2b0   : > { %v1483_v4 = vpop.eup %1482 }
 0x2b1   : > { %v1485_v7 = vpop.eup %1484  ;;  %1043 = vadd.xlane.f32.xlu1 %v1483_v4 }
 0x2b2   : > { %1041 = vadd.xlane.f32.xlu0 %v1485_v7 }
 0x30e   : > { %v1016_v6 = vpop.xlane.xlu1 %1015 }
 0x30f   : > { %1486 = vlog2.f32 %v1016_v6 }
 0x312   : > { %v1014_v9 = vpop.xlane.xlu0 %1013 }
 0x313   : > { %1488 = vlog2.f32 %v1014_v9 }
 0x316   : > { %v1020_v10 = vpop.xlane.xlu1 %1019 }
 0x317   : > { %1490 = vlog2.f32 %v1020_v10 }
 0x319   : > { %v1487_v12 = vpop.eup %1486 }
 0x31a   : > { %v1048_v13 = vmul.f32 0.6931472, %v1487_v12  ;;  %v1018_v15 = vpop.xlane.xlu0 %1017 }
 0x31b   : > { %1492 = vlog2.f32 %v1018_v15 }
 0x31c   : > { %v1078_v16 = vsub.f32 %v1767_v8, %v1048_v13 }
 0x31d   : > { %v1489_v18 = vpop.eup %1488 }
 0x31e   : > { %1094 = vst [vmem:[%s1828_s28 + $0x8] sm:$0xff] %v1078_v16  ;;  %v1046_v19 = vmul.f32 0.6931472, %v1489_v18  ;;  %v1024_v20 = vpop.xlane.xlu1 %1023 }
 0x31f   : > { %1494 = vlog2.f32 %v1024_v20  ;;  %v1022_v22 = vpop.xlane.xlu0 %1021 }
 0x320   : > { %v1077_v24 = vsub.f32 %v1770_v11, %v1046_v19  ;;  %1496 = vlog2.f32 %v1022_v22 }
 0x321   : > { %v1491_v25 = vpop.eup %1490 }
 0x322   : > { %1093 = vst [vmem:[%s1828_s28] sm:$0xff] %v1077_v24  ;;  %v1052_v26 = vmul.f32 0.6931472, %v1491_v25 }
 0x324   : > { %v1080_v27 = vsub.f32 %v1773_v14, %v1052_v26 }
 0x325   : > { %v1493_v28 = vpop.eup %1492 }
 0x326   : > { %1096 = vst [vmem:[%s1828_s28 + $0x18] sm:$0xff] %v1080_v27  ;;  %v1050_v8 = vmul.f32 0.6931472, %v1493_v28  ;;  %v1028_v30 = vpop.xlane.xlu1 %1027 }
 0x327   : > { %1498 = vlog2.f32 %v1028_v30  ;;  %v1026_v32 = vpop.xlane.xlu0 %1025 }
 0x328   : > { %v1079_v33 = vsub.f32 %v1776_v17, %v1050_v8  ;;  %1500 = vlog2.f32 %v1026_v32 }
 0x329   : > { %v1495_v34 = vpop.eup %1494 }
 0x32a   : > { %v1497_v11 = vpop.eup %1496  ;;  %1095 = vst [vmem:[%s1828_s28 + $0x10] sm:$0xff] %v1079_v33  ;;  %v1056_v35 = vmul.f32 0.6931472, %v1495_v34 }
 0x32b   : > { %v1054_v36 = vmul.f32 0.6931472, %v1497_v11 }
 0x32c   : > { %v1082_v37 = vsub.f32 %v1779_v21, %v1056_v35 }
 0x32d   : > { %v1081_v14 = vsub.f32 %v1781_v23, %v1054_v36 }
 0x32e   : > { %1098 = vst [vmem:[%s1828_s28 + $0x28] sm:$0xff] %v1082_v37  ;;  %v1032_v39 = vpop.xlane.xlu1 %1031 }
 0x32f   : > { %1097 = vst [vmem:[%s1828_s28 + $0x20] sm:$0xff] %v1081_v14  ;;  %1502 = vlog2.f32 %v1032_v39  ;;  %v1030_v41 = vpop.xlane.xlu0 %1029 }
 0x330   : > { %1504 = vlog2.f32 %v1030_v41 }
 0x331   : > { %v1499_v42 = vpop.eup %1498 }
 0x332   : > { %v1501_v17 = vpop.eup %1500  ;;  %v1060_v43 = vmul.f32 0.6931472, %v1499_v42 }
 0x333   : > { %v1058_v44 = vmul.f32 0.6931472, %v1501_v17 }
 0x334   : > { %v1084_v2 = vsub.f32 %v1785_v29, %v1060_v43 }
 0x335   : > { %v1083_v46 = vsub.f32 %v1787_v31, %v1058_v44 }
 0x336   : > { %1100 = vst [vmem:[%s1828_s28 + $0x38] sm:$0xff] %v1084_v2  ;;  %v1036_v21 = vpop.xlane.xlu1 %1035 }
 0x337   : > { %1099 = vst [vmem:[%s1828_s28 + $0x30] sm:$0xff] %v1083_v46  ;;  %1506 = vlog2.f32 %v1036_v21  ;;  %v1034_v23 = vpop.xlane.xlu0 %1033 }
 0x338   : > { %1508 = vlog2.f32 %v1034_v23 }
 0x339   : > { %v1503_v48 = vpop.eup %1502 }
 0x33a   : > { %v1505_v49 = vpop.eup %1504  ;;  %v1064_v50 = vmul.f32 0.6931472, %v1503_v48  ;;  %v1040_v52 = vpop.xlane.xlu1 %1039 }
 0x33b   : > { %v1062_v54 = vmul.f32 0.6931472, %v1505_v49  ;;  %1510 = vlog2.f32 %v1040_v52  ;;  %v1038_v55 = vpop.xlane.xlu0 %1037 }
 0x33c   : > { %v1086_v56 = vsub.f32 %v1792_v38, %v1064_v50  ;;  %1512 = vlog2.f32 %v1038_v55 }
 0x33d   : > { %v1085_v29 = vsub.f32 %v1795_v40, %v1062_v54 }
 0x33e   : > { %1102 = vst [vmem:[%s1828_s28 + $0x48] sm:$0xff] %v1086_v56  ;;  %v1044_v31 = vpop.xlane.xlu1 %1043 }
 0x33f   : > { %1101 = vst [vmem:[%s1828_s28 + $0x40] sm:$0xff] %v1085_v29  ;;  %1514 = vlog2.f32 %v1044_v31  ;;  %v1042_v57 = vpop.xlane.xlu0 %1041 }
 0x340   : > { %1516 = vlog2.f32 %v1042_v57 }
 0x341   : > { %v1507_v58 = vpop.eup %1506 }
 0x342   : > { %v1509_v60 = vpop.eup %1508  ;;  %v1068_v62 = vmul.f32 0.6931472, %v1507_v58 }
 0x343   : > { %v1066_v63 = vmul.f32 0.6931472, %v1509_v60 }
 0x344   : > { %v1088_v0 = vsub.f32 %v1800_v45, %v1068_v62 }
 0x345   : > { %v1511_v38 = vpop.eup %1510  ;;  %v1087_v1 = vsub.f32 %v1803_v47, %v1066_v63 }
 0x346   : > { %v1513_v40 = vpop.eup %1512  ;;  %1104 = vst [vmem:[%s1828_s28 + $0x58] sm:$0xff] %v1088_v0  ;;  %v1072_v3 = vmul.f32 0.6931472, %v1511_v38 }
 0x347   : > { %1103 = vst [vmem:[%s1828_s28 + $0x50] sm:$0xff] %v1087_v1  ;;  %v1070_v5 = vmul.f32 0.6931472, %v1513_v40 }
 0x348   : > { %v1090_v4 = vsub.f32 %v1808_v51, %v1072_v3 }
 0x349   : > { %v1515_v7 = vpop.eup %1514  ;;  %v1089_v6 = vsub.f32 %v1811_v53, %v1070_v5 }
 0x34a   : > { %v1517_v9 = vpop.eup %1516  ;;  %1106 = vst [vmem:[%s1828_s28 + $0x68] sm:$0xff] %v1090_v4  ;;  %v1076_v10 = vmul.f32 0.6931472, %v1515_v7 }
 0x34b   : > { %1105 = vst [vmem:[%s1828_s28 + $0x60] sm:$0xff] %v1089_v6  ;;  %v1074_v45 = vmul.f32 0.6931472, %v1517_v9 }
 0x34c   : > { %v1092_v12 = vsub.f32 %v1816_v59, %v1076_v10 }
 0x34d   : > { %v1091_v47 = vsub.f32 %v1819_v61, %v1074_v45 }
 0x34e   : > { %1108 = vst [vmem:[%s1828_s28 + $0x78] sm:$0xff] %v1092_v12 }
 0x34f   : > { %1107 = vst [vmem:[%s1828_s28 + $0x70] sm:$0xff] %v1091_v47 }
 0x350 PF: > { %s15_s20 = sadd.s32 1, %s1540_s20   ;;  %s1877_s18 = smov %s1536_s19 }
 0x351   : > { %p12_p5 = scmp.ge.s32.totalorder %s15_s20, 4   ;;  %s1878_s19 = smov %s1880_s21 }
 0x353   :  { %14 = sbr.rel (!%p12_p5) target bundleno = 2 (0x2), region = 81 }

</bundles_post_ra>
